<compile_context>
chip_gen: v7x
topology: tpu7x:2x2x1
jax: 0.10.0
libtpu: 0.0.40
codegen_flags: <defaults>
</compile_context>

<pallas_src>
import functools

import numpy as np
import jax
import jax.numpy as jnp
from jax import lax
from jax.experimental import pallas as pl
from jax.experimental.pallas import tpu as pltpu

C_STEM = 32        # proxy stem channels
C_FEAT = 64        # stand-in for resnet10t feature_info[-1]['num_chs'] (=512)
NUM_GROUPS = 8
PROJ_HIDDEN = 32   # stand-in for proj_hidden_size=256
PROJ_SIZE = 16     # stand-in for proj_size=128
NUM_CLASSES = 2
GN_EPS = 1e-5


# ----------------------------------------------------------------------------- helpers
def _full_spec(shape):
    """Whole-array block (block == full array dims), constant index map."""
    return pl.BlockSpec(shape, lambda i: (0,) * len(shape))


def _group_avg_matrix(channels, groups, count):
    """Block-diagonal [C, C] matrix: A[c,c'] = 1/count if same group else 0.
    (per-channel sums) @ A  ->  per-channel group mean broadcast back to channels."""
    cg = channels // groups
    same = (np.arange(channels)[:, None] // cg == np.arange(channels)[None, :] // cg)
    return jnp.asarray(same.astype(np.float32) / float(count))


def _conv2_selectors(h_in, w_in, h_out, w_out, stride=2, pad=1):
    """sel[k, s_out, s_in] = 1 picks the f1 row feeding 3x3 tap k at output position
    s_out (all-zero row where the tap falls into zero padding)."""
    sel = np.zeros((9, h_out * w_out, h_in * w_in), np.float32)
    for ky in range(3):
        for kx in range(3):
            k = ky * 3 + kx
            for i in range(h_out):
                for j in range(w_out):
                    r = i * stride - pad + ky
                    c = j * stride - pad + kx
                    if 0 <= r < h_in and 0 <= c < w_in:
                        sel[k, i * w_out + j, r * w_in + c] = 1.0
    return jnp.asarray(sel)


def _im2col_nhwc(x_nhwc, stride=2, pad=1):
    """3x3 patches of an NHWC tensor -> [N, Ho, Wo, Cin*9] (channel-major ordering)."""
    return lax.conv_general_dilated_patches(
        x_nhwc, filter_shape=(3, 3), window_strides=(stride, stride),
        padding=((pad, pad), (pad, pad)),
        dimension_numbers=('NHWC', 'HWIO', 'NHWC'))


# ----------------------------------------------------------------------------- kernels
def _backbone_kernel(cols1_ref, w1_ref, a1_ref, vecs1_ref,
                     sel_ref, w2_ref, a2_ref, vecs2_ref,
                     pooled_ref, *, eps, inv_s2):
    """One sample: conv1+GN+ReLU (f1 kept on-chip) -> conv2 (in-kernel patches) +
    GN(gn2)+ReLU + GN(last_bn)+ReLU -> global avg pool.
    cols1:[S1,K1]bf16  w1:[K1,Cs]bf16  a1:[Cs,Cs]f32  vecs1:[3,Cs]f32 (b1,g1,b1')
    sel:[9,S2,S1]bf16  w2:[9,Cs,Cf]bf16 a2:[Cf,Cf]f32  vecs2:[5,Cf]f32
    pooled:[1,1,Cf]f32."""
    f32, bf16 = jnp.float32, jnp.bfloat16

    def gn_relu(h, a_mat, gamma, beta):
        # Single pass over h: per-channel sum and sum-of-squares; group moments via
        # the block-diagonal averaging matmul; var = E[h^2] - mean^2 (all f32).
        mean_c = jnp.dot(jnp.sum(h, axis=0, keepdims=True), a_mat,
                         preferred_element_type=f32)
        ex2_c = jnp.dot(jnp.sum(h * h, axis=0, keepdims=True), a_mat,
                        preferred_element_type=f32)
        var_c = ex2_c - mean_c * mean_c
        return jnp.maximum((h - mean_c) * lax.rsqrt(var_c + eps) * gamma + beta, 0.0)

    # --- conv1 (im2col matmul) + bias + GN(gn1) + ReLU; f1 never leaves the chip ---
    y1 = jnp.dot(cols1_ref[...], w1_ref[...], preferred_element_type=f32) \
        + vecs1_ref[0:1, :]
    f1 = gn_relu(y1, a1_ref[...], vecs1_ref[1:2, :], vecs1_ref[2:3, :])   # [S1, Cs] f32
    f1b = f1.astype(bf16)

    # --- conv2: 3x3/stride-2 patch rows built on-chip from f1 via one-hot selectors ---
    # TODO(synk): at real resnet10t scale this would be strided slices of a padded
    # VMEM scratch (plus K-tiling / explicit vmem_limit_bytes for v7x's 64 MiB VMEM).
    s2 = sel_ref.shape[1]
    c_feat = w2_ref.shape[2]
    acc = jnp.zeros((s2, c_feat), f32)
    for k in range(9):                      # static unroll over the 9 taps
        pk = jnp.dot(sel_ref[k], f1b, preferred_element_type=f32).astype(bf16)
        acc = acc + jnp.dot(pk, w2_ref[k], preferred_element_type=f32)
    y2 = acc + vecs2_ref[0:1, :]

    h1 = gn_relu(y2, a2_ref[...], vecs2_ref[1:2, :], vecs2_ref[2:3, :])   # gn2 + ReLU
    h2 = gn_relu(h1, a2_ref[...], vecs2_ref[3:4, :], vecs2_ref[4:5, :])   # last_bn + ReLU
    pooled = jnp.sum(h2, axis=0, keepdims=True) * inv_s2                  # global avg pool
    pooled_ref[...] = pooled[None].astype(pooled_ref.dtype)               # [1,1,Cf]


def _head_kernel(x_ref, pre_w_ref, pj_in_w_ref, pj_out_w_ref,
                 pd_in_w_ref, pd_out_w_ref, cls_w_ref,
                 vh_ref, vps_ref, cls_b_ref, ah_ref,
                 lat_ref, z_ref, r_ref, prob_ref, *, eps):
    """Whole post-pool head fused in one kernel (bf16 MXU operands, f32 elementwise).
    vh:[7,H]=(pre_b,pj_in_b,pj_g,pj_b,pd_in_b,pd_g,pd_b)  vps:[2,PS]=(pj_out_b,pd_out_b)."""
    f32, bf16 = jnp.float32, jnp.bfloat16
    a_h = ah_ref[...]

    def gn_relu(h, gamma, beta):            # per-row GroupNorm over channels
        mean_c = jnp.dot(h, a_h, preferred_element_type=f32)
        ex2_c = jnp.dot(h * h, a_h, preferred_element_type=f32)
        var_c = ex2_c - mean_c * mean_c
        return jnp.maximum((h - mean_c) * lax.rsqrt(var_c + eps) * gamma + beta, 0.0)

    latent = jnp.maximum(
        jnp.dot(x_ref[...].astype(bf16), pre_w_ref[...], preferred_element_type=f32)
        + vh_ref[0:1, :], 0.0)                                            # [N, H]
    lat_b = latent.astype(bf16)

    # projector: Linear -> GroupNorm -> ReLU -> Linear
    z = jnp.dot(lat_b, pj_in_w_ref[...], preferred_element_type=f32) + vh_ref[1:2, :]
    z = gn_relu(z, vh_ref[2:3, :], vh_ref[3:4, :])
    z_proj = jnp.dot(z.astype(bf16), pj_out_w_ref[...],
                     preferred_element_type=f32) + vps_ref[0:1, :]

    # predictor: Linear -> GroupNorm -> ReLU -> Linear
    r = jnp.dot(z_proj.astype(bf16), pd_in_w_ref[...],
                preferred_element_type=f32) + vh_ref[4:5, :]
    r = gn_relu(r, vh_ref[5:6, :], vh_ref[6:7, :])
    r_pred = jnp.dot(r.astype(bf16), pd_out_w_ref[...],
                     preferred_element_type=f32) + vps_ref[1:2, :]

    # classifier: Linear -> Softmax(dim=-1)  (reference applies Softmax in forward)
    logits = jnp.dot(lat_b, cls_w_ref[...], preferred_element_type=f32) + cls_b_ref[...]
    m = jnp.max(logits, axis=-1, keepdims=True)
    e = jnp.exp(logits - m)
    probs = e / jnp.sum(e, axis=-1, keepdims=True)

    lat_ref[...] = latent.astype(lat_ref.dtype)
    z_ref[...] = z_proj.astype(z_ref.dtype)
    r_ref[...] = r_pred.astype(r_ref.dtype)
    prob_ref[...] = probs.astype(prob_ref.dtype)


# ----------------------------------------------------------------------------- wrappers
def backbone_fused(cols1, p, *, n, s1, h1, w1, h2, w2):
    k1 = cols1.shape[1]
    s2 = h2 * w2
    bf16 = jnp.bfloat16
    w1m = p['conv1_w'].reshape(C_STEM, k1).T.astype(bf16)                  # [K1, Cs]
    # w2m[k][cin, cout] = conv2_w[cout, cin, ky, kx], k = ky*3+kx (matches selectors)
    w2m = jnp.transpose(p['conv2_w'], (2, 3, 1, 0)).reshape(9, C_STEM, C_FEAT).astype(bf16)
    sel = _conv2_selectors(h1, w1, h2, w2).astype(bf16)                    # [9, S2, S1]
    a1 = _group_avg_matrix(C_STEM, NUM_GROUPS, (C_STEM // NUM_GROUPS) * s1)
    a2 = _group_avg_matrix(C_FEAT, NUM_GROUPS, (C_FEAT // NUM_GROUPS) * s2)
    vecs1 = jnp.stack([p['conv1_b'], p['gn1_w'], p['gn1_b']], axis=0)      # [3, Cs]
    vecs2 = jnp.stack([p['conv2_b'], p['gn2_w'], p['gn2_b'],
                       p['last_bn_w'], p['last_bn_b']], axis=0)            # [5, Cf]

    out = pl.pallas_call(
        functools.partial(_backbone_kernel, eps=GN_EPS, inv_s2=1.0 / s2),
        out_shape=jax.ShapeDtypeStruct((n, 1, C_FEAT), jnp.float32),
        grid=(n,),
        in_specs=[
            pl.BlockSpec((s1, k1), lambda i: (i, 0)),   # per-sample im2col rows
            _full_spec((k1, C_STEM)),
            _full_spec((C_STEM, C_STEM)),
            _full_spec((3, C_STEM)),
            _full_spec((9, s2, s1)),
            _full_spec((9, C_STEM, C_FEAT)),
            _full_spec((C_FEAT, C_FEAT)),
            _full_spec((5, C_FEAT)),
        ],
        out_specs=pl.BlockSpec((1, 1, C_FEAT), lambda i: (i, 0, 0)),
        compiler_params=pltpu.CompilerParams(dimension_semantics=("parallel",)),
    )(cols1, w1m, a1, vecs1, sel, w2m, a2, vecs2)
    return out.reshape(n, C_FEAT)


def fused_head(pooled, p):
    n = pooled.shape[0]
    h, ps, nc = PROJ_HIDDEN, PROJ_SIZE, NUM_CLASSES
    bf16 = jnp.bfloat16
    a_h = _group_avg_matrix(h, NUM_GROUPS, h // NUM_GROUPS)
    vec_h = jnp.stack([p['pre_hidden_b'], p['proj_in_b'], p['proj_bn_w'], p['proj_bn_b'],
                       p['pred_in_b'], p['pred_bn_w'], p['pred_bn_b']], axis=0)  # [7, H]
    vec_ps = jnp.stack([p['proj_out_b'], p['pred_out_b']], axis=0)               # [2, PS]
    args = (pooled,
            p['pre_hidden_w'].astype(bf16), p['proj_in_w'].astype(bf16),
            p['proj_out_w'].astype(bf16), p['pred_in_w'].astype(bf16),
            p['pred_out_w'].astype(bf16), p['cls_w'].astype(bf16),
            vec_h, vec_ps, p['cls_b'].reshape(1, nc), a_h)
    return pl.pallas_call(
        functools.partial(_head_kernel, eps=GN_EPS),
        out_shape=(jax.ShapeDtypeStruct((n, h), jnp.float32),
                   jax.ShapeDtypeStruct((n, ps), jnp.float32),
                   jax.ShapeDtypeStruct((n, ps), jnp.float32),
                   jax.ShapeDtypeStruct((n, nc), jnp.float32)),
        grid=(1,),
        in_specs=[_full_spec(a.shape) for a in args],
        out_specs=(_full_spec((n, h)), _full_spec((n, ps)),
                   _full_spec((n, ps)), _full_spec((n, nc))),
        compiler_params=pltpu.CompilerParams(dimension_semantics=("arbitrary",)),
    )(*args)


# ----------------------------------------------------------------------------- params
def init_params(key):
    ks = jax.random.split(key, 8)

    def lin(k, fan_in, fan_out):
        kw, kb = jax.random.split(k)
        bound = 1.0 / (fan_in ** 0.5)
        w = jax.random.uniform(kw, (fan_in, fan_out), minval=-bound, maxval=bound,
                               dtype=jnp.float32)
        b = jax.random.uniform(kb, (fan_out,), minval=-bound, maxval=bound,
                               dtype=jnp.float32)
        return w, b

    def conv(k, cout, cin):
        kw, kb = jax.random.split(k)
        bound = 1.0 / ((cin * 9) ** 0.5)
        w = jax.random.uniform(kw, (cout, cin, 3, 3), minval=-bound, maxval=bound,
                               dtype=jnp.float32)
        b = jax.random.uniform(kb, (cout,), minval=-bound, maxval=bound,
                               dtype=jnp.float32)
        return w, b

    p = {}
    p['conv1_w'], p['conv1_b'] = conv(ks[0], C_STEM, 1)
    p['gn1_w'], p['gn1_b'] = jnp.ones((C_STEM,), jnp.float32), jnp.zeros((C_STEM,), jnp.float32)
    p['conv2_w'], p['conv2_b'] = conv(ks[1], C_FEAT, C_STEM)
    p['gn2_w'], p['gn2_b'] = jnp.ones((C_FEAT,), jnp.float32), jnp.zeros((C_FEAT,), jnp.float32)
    p['last_bn_w'], p['last_bn_b'] = jnp.ones((C_FEAT,), jnp.float32), jnp.zeros((C_FEAT,), jnp.float32)
    p['pre_hidden_w'], p['pre_hidden_b'] = lin(ks[2], C_FEAT, PROJ_HIDDEN)
    p['proj_in_w'], p['proj_in_b'] = lin(ks[3], PROJ_HIDDEN, PROJ_HIDDEN)
    p['proj_bn_w'], p['proj_bn_b'] = jnp.ones((PROJ_HIDDEN,), jnp.float32), jnp.zeros((PROJ_HIDDEN,), jnp.float32)
    p['proj_out_w'], p['proj_out_b'] = lin(ks[4], PROJ_HIDDEN, PROJ_SIZE)
    p['pred_in_w'], p['pred_in_b'] = lin(ks[5], PROJ_SIZE, PROJ_HIDDEN)
    p['pred_bn_w'], p['pred_bn_b'] = jnp.ones((PROJ_HIDDEN,), jnp.float32), jnp.zeros((PROJ_HIDDEN,), jnp.float32)
    p['pred_out_w'], p['pred_out_b'] = lin(ks[6], PROJ_HIDDEN, PROJ_SIZE)
    p['cls_w'], p['cls_b'] = lin(ks[7], PROJ_HIDDEN, NUM_CLASSES)
    return p


# ----------------------------------------------------------------------------- forward
def yshape_forward(params, x):
    n = x.shape[0]
    # single NCHW -> NHWC transpose at the input boundary; channels-last thereafter.
    xh = jnp.transpose(x, (0, 2, 3, 1))

    # --- feature extractor (resnet10t stand-in) ---
    # TODO(synk): the full timm resnet10t backbone (tiered stem, maxpool, 4 residual
    # stages) is not replicated; it is proxied by two conv3x3/stride2 + GroupNorm +
    # ReLU stages producing the final feature map with C_FEAT channels.
    p1 = _im2col_nhwc(xh)                                      # [N, H1, W1, Cin*9]
    _, h1, w1, k1 = p1.shape
    cols1 = p1.reshape(n * h1 * w1, k1).astype(jnp.bfloat16)   # bf16 MXU operand
    h2 = (h1 + 2 - 3) // 2 + 1
    w2 = (w1 + 2 - 3) // 2 + 1
    # conv1+GN+ReLU -> conv2+GN+ReLU+GN(last_bn)+ReLU -> global avg pool, all fused.
    pooled = backbone_fused(cols1, params, n=n, s1=h1 * w1,
                            h1=h1, w1=w1, h2=h2, w2=w2)        # [N, C_FEAT]

    # --- fused MLP head (pre_hidden / projector / predictor / classifier) ---
    latent, z_proj, r_pred, logits = fused_head(pooled, params)
    return latent, z_proj, r_pred, logits


if __name__ == "__main__":
    key = jax.random.PRNGKey(0)
    kx, kp = jax.random.split(key)
    x = jax.random.normal(kx, (2, 1, 16, 16), dtype=jnp.float32)
    params = init_params(kp)
    fwd = jax.jit(yshape_forward)
    latent, z_proj, r_pred, logits = jax.block_until_ready(fwd(params, x))
    assert latent.shape == (2, PROJ_HIDDEN)
    assert z_proj.shape == (2, PROJ_SIZE)
    assert r_pred.shape == (2, PROJ_SIZE)
    assert logits.shape == (2, NUM_CLASSES)
    assert bool(jnp.all(jnp.isfinite(latent)))
    assert bool(jnp.all(jnp.isfinite(logits)))
    print("KERNEL_OK")
</pallas_src>

<mosaic_0001>
module attributes {stable_mosaic.version = 11 : i64} {
  func.func @_backbone_kernel(%arg0: i32, %arg1: memref<64x9xbf16, #tpu.memory_space<vmem>>, %arg2: memref<9x32xbf16, #tpu.memory_space<vmem>>, %arg3: memref<32x32xf32, #tpu.memory_space<vmem>>, %arg4: memref<3x32xf32, #tpu.memory_space<vmem>>, %arg5: memref<9x16x64xbf16, #tpu.memory_space<vmem>>, %arg6: memref<9x32x64xbf16, #tpu.memory_space<vmem>>, %arg7: memref<64x64xf32, #tpu.memory_space<vmem>>, %arg8: memref<5x64xf32, #tpu.memory_space<vmem>>, %arg9: memref<1x1x64xf32, #tpu.memory_space<vmem>>) attributes {dimension_semantics = [#tpu.dimension_semantics<parallel>], iteration_bounds = array<i64: 2>, scalar_prefetch = 0 : i64, scratch_operands = 0 : i64, tpu.core_type = #tpu.core_type<tc>, window_params = [{transform_indices = @transform_0, window_bounds = array<i64: 64, 9>}, {pipeline_mode = #tpu.pipeline_mode<synchronous>, transform_indices = @transform_1, window_bounds = array<i64: 9, 32>}, {pipeline_mode = #tpu.pipeline_mode<synchronous>, transform_indices = @transform_2, window_bounds = array<i64: 32, 32>}, {pipeline_mode = #tpu.pipeline_mode<synchronous>, transform_indices = @transform_3, window_bounds = array<i64: 3, 32>}, {pipeline_mode = #tpu.pipeline_mode<synchronous>, transform_indices = @transform_4, window_bounds = array<i64: 9, 16, 64>}, {pipeline_mode = #tpu.pipeline_mode<synchronous>, transform_indices = @transform_5, window_bounds = array<i64: 9, 32, 64>}, {pipeline_mode = #tpu.pipeline_mode<synchronous>, transform_indices = @transform_6, window_bounds = array<i64: 64, 64>}, {pipeline_mode = #tpu.pipeline_mode<synchronous>, transform_indices = @transform_7, window_bounds = array<i64: 5, 64>}, {transform_indices = @transform_8, window_bounds = array<i64: 1, 1, 64>}]} {
    %c0 = arith.constant 0 : index
    %c0_0 = arith.constant 0 : index
    %0 = vector.load %arg1[%c0, %c0_0] : memref<64x9xbf16, #tpu.memory_space<vmem>>, vector<64x9xbf16>
    %c0_1 = arith.constant 0 : index
    %c0_2 = arith.constant 0 : index
    %1 = vector.load %arg2[%c0_1, %c0_2] : memref<9x32xbf16, #tpu.memory_space<vmem>>, vector<9x32xbf16>
    %cst = arith.constant dense<0.000000e+00> : vector<64x32xf32>
    %2 = tpu.matmul %0, %1, %cst {dimension_numbers = #tpu.dot_dimension_numbers<[1], [0], [0], [1], [0, 0, 1, 1], [], []>} : vector<64x9xbf16>, vector<9x32xbf16>, vector<64x32xf32> -> vector<64x32xf32>
    %c0_3 = arith.constant 0 : index
    %c0_4 = arith.constant 0 : index
    %3 = vector.load %arg4[%c0_3, %c0_4] : memref<3x32xf32, #tpu.memory_space<vmem>>, vector<1x32xf32>
    %4 = vector.broadcast %3 : vector<1x32xf32> to vector<64x32xf32>
    %5 = arith.addf %2, %4 : vector<64x32xf32>
    %c0_5 = arith.constant 0 : index
    %c0_6 = arith.constant 0 : index
    %6 = vector.load %arg3[%c0_5, %c0_6] : memref<32x32xf32, #tpu.memory_space<vmem>>, vector<32x32xf32>
    %c1 = arith.constant 1 : index
    %c0_7 = arith.constant 0 : index
    %7 = vector.load %arg4[%c1, %c0_7] : memref<3x32xf32, #tpu.memory_space<vmem>>, vector<1x32xf32>
    %c2 = arith.constant 2 : index
    %c0_8 = arith.constant 0 : index
    %8 = vector.load %arg4[%c2, %c0_8] : memref<3x32xf32, #tpu.memory_space<vmem>>, vector<1x32xf32>
    %cst_9 = arith.constant dense<0.000000e+00> : vector<32xf32>
    %9 = vector.multi_reduction <add>, %5, %cst_9 [0] : vector<64x32xf32> to vector<32xf32>
    %10 = vector.shape_cast %9 : vector<32xf32> to vector<1x32xf32>
    %cst_10 = arith.constant dense<0.000000e+00> : vector<1x32xf32>
    %11 = tpu.matmul %10, %6, %cst_10 {dimension_numbers = #tpu.dot_dimension_numbers<[1], [0], [0], [1], [0, 0, 1, 1], [], []>} : vector<1x32xf32>, vector<32x32xf32>, vector<1x32xf32> -> vector<1x32xf32>
    %12 = arith.mulf %5, %5 : vector<64x32xf32>
    %cst_11 = arith.constant dense<0.000000e+00> : vector<32xf32>
    %13 = vector.multi_reduction <add>, %12, %cst_11 [0] : vector<64x32xf32> to vector<32xf32>
    %14 = vector.shape_cast %13 : vector<32xf32> to vector<1x32xf32>
    %cst_12 = arith.constant dense<0.000000e+00> : vector<1x32xf32>
    %15 = tpu.matmul %14, %6, %cst_12 {dimension_numbers = #tpu.dot_dimension_numbers<[1], [0], [0], [1], [0, 0, 1, 1], [], []>} : vector<1x32xf32>, vector<32x32xf32>, vector<1x32xf32> -> vector<1x32xf32>
    %16 = arith.mulf %11, %11 : vector<1x32xf32>
    %17 = arith.subf %15, %16 : vector<1x32xf32>
    %18 = vector.broadcast %11 : vector<1x32xf32> to vector<64x32xf32>
    %19 = arith.subf %5, %18 : vector<64x32xf32>
    %cst_13 = arith.constant 9.99999974E-6 : f32
    %20 = vector.broadcast %cst_13 : f32 to vector<1x32xf32>
    %21 = arith.addf %17, %20 : vector<1x32xf32>
    %22 = math.rsqrt %21 : vector<1x32xf32>
    %23 = vector.broadcast %22 : vector<1x32xf32> to vector<64x32xf32>
    %24 = arith.mulf %19, %23 : vector<64x32xf32>
    %25 = vector.broadcast %7 : vector<1x32xf32> to vector<64x32xf32>
    %26 = arith.mulf %24, %25 : vector<64x32xf32>
    %27 = vector.broadcast %8 : vector<1x32xf32> to vector<64x32xf32>
    %28 = arith.addf %26, %27 : vector<64x32xf32>
    %cst_14 = arith.constant 0.000000e+00 : f32
    %29 = vector.broadcast %cst_14 : f32 to vector<64x32xf32>
    %30 = arith.maximumf %28, %29 : vector<64x32xf32>
    %31 = arith.truncf %30 : vector<64x32xf32> to vector<64x32xbf16>
    %cst_15 = arith.constant 0.000000e+00 : f32
    %32 = vector.broadcast %cst_15 : f32 to vector<16x64xf32>
    %c0_16 = arith.constant 0 : index
    %c0_17 = arith.constant 0 : index
    %c0_18 = arith.constant 0 : index
    %33 = vector.load %arg5[%c0_16, %c0_17, %c0_18] : memref<9x16x64xbf16, #tpu.memory_space<vmem>>, vector<1x16x64xbf16>
    %34 = vector.shape_cast %33 : vector<1x16x64xbf16> to vector<16x64xbf16>
    %cst_19 = arith.constant dense<0.000000e+00> : vector<16x32xf32>
    %35 = tpu.matmul %34, %31, %cst_19 {dimension_numbers = #tpu.dot_dimension_numbers<[1], [0], [0], [1], [0, 0, 1, 1], [], []>} : vector<16x64xbf16>, vector<64x32xbf16>, vector<16x32xf32> -> vector<16x32xf32>
    %36 = arith.truncf %35 : vector<16x32xf32> to vector<16x32xbf16>
    %c0_20 = arith.constant 0 : index
    %c0_21 = arith.constant 0 : index
    %c0_22 = arith.constant 0 : index
    %37 = vector.load %arg6[%c0_20, %c0_21, %c0_22] : memref<9x32x64xbf16, #tpu.memory_space<vmem>>, vector<1x32x64xbf16>
    %38 = vector.shape_cast %37 : vector<1x32x64xbf16> to vector<32x64xbf16>
    %cst_23 = arith.constant dense<0.000000e+00> : vector<16x64xf32>
    %39 = tpu.matmul %36, %38, %cst_23 {dimension_numbers = #tpu.dot_dimension_numbers<[1], [0], [0], [1], [0, 0, 1, 1], [], []>} : vector<16x32xbf16>, vector<32x64xbf16>, vector<16x64xf32> -> vector<16x64xf32>
    %40 = arith.addf %32, %39 : vector<16x64xf32>
    %c1_24 = arith.constant 1 : index
    %c0_25 = arith.constant 0 : index
    %c0_26 = arith.constant 0 : index
    %41 = vector.load %arg5[%c1_24, %c0_25, %c0_26] : memref<9x16x64xbf16, #tpu.memory_space<vmem>>, vector<1x16x64xbf16>
    %42 = vector.shape_cast %41 : vector<1x16x64xbf16> to vector<16x64xbf16>
    %cst_27 = arith.constant dense<0.000000e+00> : vector<16x32xf32>
    %43 = tpu.matmul %42, %31, %cst_27 {dimension_numbers = #tpu.dot_dimension_numbers<[1], [0], [0], [1], [0, 0, 1, 1], [], []>} : vector<16x64xbf16>, vector<64x32xbf16>, vector<16x32xf32> -> vector<16x32xf32>
    %44 = arith.truncf %43 : vector<16x32xf32> to vector<16x32xbf16>
    %c1_28 = arith.constant 1 : index
    %c0_29 = arith.constant 0 : index
    %c0_30 = arith.constant 0 : index
    %45 = vector.load %arg6[%c1_28, %c0_29, %c0_30] : memref<9x32x64xbf16, #tpu.memory_space<vmem>>, vector<1x32x64xbf16>
    %46 = vector.shape_cast %45 : vector<1x32x64xbf16> to vector<32x64xbf16>
    %cst_31 = arith.constant dense<0.000000e+00> : vector<16x64xf32>
    %47 = tpu.matmul %44, %46, %cst_31 {dimension_numbers = #tpu.dot_dimension_numbers<[1], [0], [0], [1], [0, 0, 1, 1], [], []>} : vector<16x32xbf16>, vector<32x64xbf16>, vector<16x64xf32> -> vector<16x64xf32>
    %48 = arith.addf %40, %47 : vector<16x64xf32>
    %c2_32 = arith.constant 2 : index
    %c0_33 = arith.constant 0 : index
    %c0_34 = arith.constant 0 : index
    %49 = vector.load %arg5[%c2_32, %c0_33, %c0_34] : memref<9x16x64xbf16, #tpu.memory_space<vmem>>, vector<1x16x64xbf16>
    %50 = vector.shape_cast %49 : vector<1x16x64xbf16> to vector<16x64xbf16>
    %cst_35 = arith.constant dense<0.000000e+00> : vector<16x32xf32>
    %51 = tpu.matmul %50, %31, %cst_35 {dimension_numbers = #tpu.dot_dimension_numbers<[1], [0], [0], [1], [0, 0, 1, 1], [], []>} : vector<16x64xbf16>, vector<64x32xbf16>, vector<16x32xf32> -> vector<16x32xf32>
    %52 = arith.truncf %51 : vector<16x32xf32> to vector<16x32xbf16>
    %c2_36 = arith.constant 2 : index
    %c0_37 = arith.constant 0 : index
    %c0_38 = arith.constant 0 : index
    %53 = vector.load %arg6[%c2_36, %c0_37, %c0_38] : memref<9x32x64xbf16, #tpu.memory_space<vmem>>, vector<1x32x64xbf16>
    %54 = vector.shape_cast %53 : vector<1x32x64xbf16> to vector<32x64xbf16>
    %cst_39 = arith.constant dense<0.000000e+00> : vector<16x64xf32>
    %55 = tpu.matmul %52, %54, %cst_39 {dimension_numbers = #tpu.dot_dimension_numbers<[1], [0], [0], [1], [0, 0, 1, 1], [], []>} : vector<16x32xbf16>, vector<32x64xbf16>, vector<16x64xf32> -> vector<16x64xf32>
    %56 = arith.addf %48, %55 : vector<16x64xf32>
    %c3 = arith.constant 3 : index
    %c0_40 = arith.constant 0 : index
    %c0_41 = arith.constant 0 : index
    %57 = vector.load %arg5[%c3, %c0_40, %c0_41] : memref<9x16x64xbf16, #tpu.memory_space<vmem>>, vector<1x16x64xbf16>
    %58 = vector.shape_cast %57 : vector<1x16x64xbf16> to vector<16x64xbf16>
    %cst_42 = arith.constant dense<0.000000e+00> : vector<16x32xf32>
    %59 = tpu.matmul %58, %31, %cst_42 {dimension_numbers = #tpu.dot_dimension_numbers<[1], [0], [0], [1], [0, 0, 1, 1], [], []>} : vector<16x64xbf16>, vector<64x32xbf16>, vector<16x32xf32> -> vector<16x32xf32>
    %60 = arith.truncf %59 : vector<16x32xf32> to vector<16x32xbf16>
    %c3_43 = arith.constant 3 : index
    %c0_44 = arith.constant 0 : index
    %c0_45 = arith.constant 0 : index
    %61 = vector.load %arg6[%c3_43, %c0_44, %c0_45] : memref<9x32x64xbf16, #tpu.memory_space<vmem>>, vector<1x32x64xbf16>
    %62 = vector.shape_cast %61 : vector<1x32x64xbf16> to vector<32x64xbf16>
    %cst_46 = arith.constant dense<0.000000e+00> : vector<16x64xf32>
    %63 = tpu.matmul %60, %62, %cst_46 {dimension_numbers = #tpu.dot_dimension_numbers<[1], [0], [0], [1], [0, 0, 1, 1], [], []>} : vector<16x32xbf16>, vector<32x64xbf16>, vector<16x64xf32> -> vector<16x64xf32>
    %64 = arith.addf %56, %63 : vector<16x64xf32>
    %c4 = arith.constant 4 : index
    %c0_47 = arith.constant 0 : index
    %c0_48 = arith.constant 0 : index
    %65 = vector.load %arg5[%c4, %c0_47, %c0_48] : memref<9x16x64xbf16, #tpu.memory_space<vmem>>, vector<1x16x64xbf16>
    %66 = vector.shape_cast %65 : vector<1x16x64xbf16> to vector<16x64xbf16>
    %cst_49 = arith.constant dense<0.000000e+00> : vector<16x32xf32>
    %67 = tpu.matmul %66, %31, %cst_49 {dimension_numbers = #tpu.dot_dimension_numbers<[1], [0], [0], [1], [0, 0, 1, 1], [], []>} : vector<16x64xbf16>, vector<64x32xbf16>, vector<16x32xf32> -> vector<16x32xf32>
    %68 = arith.truncf %67 : vector<16x32xf32> to vector<16x32xbf16>
    %c4_50 = arith.constant 4 : index
    %c0_51 = arith.constant 0 : index
    %c0_52 = arith.constant 0 : index
    %69 = vector.load %arg6[%c4_50, %c0_51, %c0_52] : memref<9x32x64xbf16, #tpu.memory_space<vmem>>, vector<1x32x64xbf16>
    %70 = vector.shape_cast %69 : vector<1x32x64xbf16> to vector<32x64xbf16>
    %cst_53 = arith.constant dense<0.000000e+00> : vector<16x64xf32>
    %71 = tpu.matmul %68, %70, %cst_53 {dimension_numbers = #tpu.dot_dimension_numbers<[1], [0], [0], [1], [0, 0, 1, 1], [], []>} : vector<16x32xbf16>, vector<32x64xbf16>, vector<16x64xf32> -> vector<16x64xf32>
    %72 = arith.addf %64, %71 : vector<16x64xf32>
    %c5 = arith.constant 5 : index
    %c0_54 = arith.constant 0 : index
    %c0_55 = arith.constant 0 : index
    %73 = vector.load %arg5[%c5, %c0_54, %c0_55] : memref<9x16x64xbf16, #tpu.memory_space<vmem>>, vector<1x16x64xbf16>
    %74 = vector.shape_cast %73 : vector<1x16x64xbf16> to vector<16x64xbf16>
    %cst_56 = arith.constant dense<0.000000e+00> : vector<16x32xf32>
    %75 = tpu.matmul %74, %31, %cst_56 {dimension_numbers = #tpu.dot_dimension_numbers<[1], [0], [0], [1], [0, 0, 1, 1], [], []>} : vector<16x64xbf16>, vector<64x32xbf16>, vector<16x32xf32> -> vector<16x32xf32>
    %76 = arith.truncf %75 : vector<16x32xf32> to vector<16x32xbf16>
    %c5_57 = arith.constant 5 : index
    %c0_58 = arith.constant 0 : index
    %c0_59 = arith.constant 0 : index
    %77 = vector.load %arg6[%c5_57, %c0_58, %c0_59] : memref<9x32x64xbf16, #tpu.memory_space<vmem>>, vector<1x32x64xbf16>
    %78 = vector.shape_cast %77 : vector<1x32x64xbf16> to vector<32x64xbf16>
    %cst_60 = arith.constant dense<0.000000e+00> : vector<16x64xf32>
    %79 = tpu.matmul %76, %78, %cst_60 {dimension_numbers = #tpu.dot_dimension_numbers<[1], [0], [0], [1], [0, 0, 1, 1], [], []>} : vector<16x32xbf16>, vector<32x64xbf16>, vector<16x64xf32> -> vector<16x64xf32>
    %80 = arith.addf %72, %79 : vector<16x64xf32>
    %c6 = arith.constant 6 : index
    %c0_61 = arith.constant 0 : index
    %c0_62 = arith.constant 0 : index
    %81 = vector.load %arg5[%c6, %c0_61, %c0_62] : memref<9x16x64xbf16, #tpu.memory_space<vmem>>, vector<1x16x64xbf16>
    %82 = vector.shape_cast %81 : vector<1x16x64xbf16> to vector<16x64xbf16>
    %cst_63 = arith.constant dense<0.000000e+00> : vector<16x32xf32>
    %83 = tpu.matmul %82, %31, %cst_63 {dimension_numbers = #tpu.dot_dimension_numbers<[1], [0], [0], [1], [0, 0, 1, 1], [], []>} : vector<16x64xbf16>, vector<64x32xbf16>, vector<16x32xf32> -> vector<16x32xf32>
    %84 = arith.truncf %83 : vector<16x32xf32> to vector<16x32xbf16>
    %c6_64 = arith.constant 6 : index
    %c0_65 = arith.constant 0 : index
    %c0_66 = arith.constant 0 : index
    %85 = vector.load %arg6[%c6_64, %c0_65, %c0_66] : memref<9x32x64xbf16, #tpu.memory_space<vmem>>, vector<1x32x64xbf16>
    %86 = vector.shape_cast %85 : vector<1x32x64xbf16> to vector<32x64xbf16>
    %cst_67 = arith.constant dense<0.000000e+00> : vector<16x64xf32>
    %87 = tpu.matmul %84, %86, %cst_67 {dimension_numbers = #tpu.dot_dimension_numbers<[1], [0], [0], [1], [0, 0, 1, 1], [], []>} : vector<16x32xbf16>, vector<32x64xbf16>, vector<16x64xf32> -> vector<16x64xf32>
    %88 = arith.addf %80, %87 : vector<16x64xf32>
    %c7 = arith.constant 7 : index
    %c0_68 = arith.constant 0 : index
    %c0_69 = arith.constant 0 : index
    %89 = vector.load %arg5[%c7, %c0_68, %c0_69] : memref<9x16x64xbf16, #tpu.memory_space<vmem>>, vector<1x16x64xbf16>
    %90 = vector.shape_cast %89 : vector<1x16x64xbf16> to vector<16x64xbf16>
    %cst_70 = arith.constant dense<0.000000e+00> : vector<16x32xf32>
    %91 = tpu.matmul %90, %31, %cst_70 {dimension_numbers = #tpu.dot_dimension_numbers<[1], [0], [0], [1], [0, 0, 1, 1], [], []>} : vector<16x64xbf16>, vector<64x32xbf16>, vector<16x32xf32> -> vector<16x32xf32>
    %92 = arith.truncf %91 : vector<16x32xf32> to vector<16x32xbf16>
    %c7_71 = arith.constant 7 : index
    %c0_72 = arith.constant 0 : index
    %c0_73 = arith.constant 0 : index
    %93 = vector.load %arg6[%c7_71, %c0_72, %c0_73] : memref<9x32x64xbf16, #tpu.memory_space<vmem>>, vector<1x32x64xbf16>
    %94 = vector.shape_cast %93 : vector<1x32x64xbf16> to vector<32x64xbf16>
    %cst_74 = arith.constant dense<0.000000e+00> : vector<16x64xf32>
    %95 = tpu.matmul %92, %94, %cst_74 {dimension_numbers = #tpu.dot_dimension_numbers<[1], [0], [0], [1], [0, 0, 1, 1], [], []>} : vector<16x32xbf16>, vector<32x64xbf16>, vector<16x64xf32> -> vector<16x64xf32>
    %96 = arith.addf %88, %95 : vector<16x64xf32>
    %c8 = arith.constant 8 : index
    %c0_75 = arith.constant 0 : index
    %c0_76 = arith.constant 0 : index
    %97 = vector.load %arg5[%c8, %c0_75, %c0_76] : memref<9x16x64xbf16, #tpu.memory_space<vmem>>, vector<1x16x64xbf16>
    %98 = vector.shape_cast %97 : vector<1x16x64xbf16> to vector<16x64xbf16>
    %cst_77 = arith.constant dense<0.000000e+00> : vector<16x32xf32>
    %99 = tpu.matmul %98, %31, %cst_77 {dimension_numbers = #tpu.dot_dimension_numbers<[1], [0], [0], [1], [0, 0, 1, 1], [], []>} : vector<16x64xbf16>, vector<64x32xbf16>, vector<16x32xf32> -> vector<16x32xf32>
    %100 = arith.truncf %99 : vector<16x32xf32> to vector<16x32xbf16>
    %c8_78 = arith.constant 8 : index
    %c0_79 = arith.constant 0 : index
    %c0_80 = arith.constant 0 : index
    %101 = vector.load %arg6[%c8_78, %c0_79, %c0_80] : memref<9x32x64xbf16, #tpu.memory_space<vmem>>, vector<1x32x64xbf16>
    %102 = vector.shape_cast %101 : vector<1x32x64xbf16> to vector<32x64xbf16>
    %cst_81 = arith.constant dense<0.000000e+00> : vector<16x64xf32>
    %103 = tpu.matmul %100, %102, %cst_81 {dimension_numbers = #tpu.dot_dimension_numbers<[1], [0], [0], [1], [0, 0, 1, 1], [], []>} : vector<16x32xbf16>, vector<32x64xbf16>, vector<16x64xf32> -> vector<16x64xf32>
    %104 = arith.addf %96, %103 : vector<16x64xf32>
    %c0_82 = arith.constant 0 : index
    %c0_83 = arith.constant 0 : index
    %105 = vector.load %arg8[%c0_82, %c0_83] : memref<5x64xf32, #tpu.memory_space<vmem>>, vector<1x64xf32>
    %106 = vector.broadcast %105 : vector<1x64xf32> to vector<16x64xf32>
    %107 = arith.addf %104, %106 : vector<16x64xf32>
    %c0_84 = arith.constant 0 : index
    %c0_85 = arith.constant 0 : index
    %108 = vector.load %arg7[%c0_84, %c0_85] : memref<64x64xf32, #tpu.memory_space<vmem>>, vector<64x64xf32>
    %c1_86 = arith.constant 1 : index
    %c0_87 = arith.constant 0 : index
    %109 = vector.load %arg8[%c1_86, %c0_87] : memref<5x64xf32, #tpu.memory_space<vmem>>, vector<1x64xf32>
    %c2_88 = arith.constant 2 : index
    %c0_89 = arith.constant 0 : index
    %110 = vector.load %arg8[%c2_88, %c0_89] : memref<5x64xf32, #tpu.memory_space<vmem>>, vector<1x64xf32>
    %cst_90 = arith.constant dense<0.000000e+00> : vector<64xf32>
    %111 = vector.multi_reduction <add>, %107, %cst_90 [0] : vector<16x64xf32> to vector<64xf32>
    %112 = vector.shape_cast %111 : vector<64xf32> to vector<1x64xf32>
    %cst_91 = arith.constant dense<0.000000e+00> : vector<1x64xf32>
    %113 = tpu.matmul %112, %108, %cst_91 {dimension_numbers = #tpu.dot_dimension_numbers<[1], [0], [0], [1], [0, 0, 1, 1], [], []>} : vector<1x64xf32>, vector<64x64xf32>, vector<1x64xf32> -> vector<1x64xf32>
    %114 = arith.mulf %107, %107 : vector<16x64xf32>
    %cst_92 = arith.constant dense<0.000000e+00> : vector<64xf32>
    %115 = vector.multi_reduction <add>, %114, %cst_92 [0] : vector<16x64xf32> to vector<64xf32>
    %116 = vector.shape_cast %115 : vector<64xf32> to vector<1x64xf32>
    %cst_93 = arith.constant dense<0.000000e+00> : vector<1x64xf32>
    %117 = tpu.matmul %116, %108, %cst_93 {dimension_numbers = #tpu.dot_dimension_numbers<[1], [0], [0], [1], [0, 0, 1, 1], [], []>} : vector<1x64xf32>, vector<64x64xf32>, vector<1x64xf32> -> vector<1x64xf32>
    %118 = arith.mulf %113, %113 : vector<1x64xf32>
    %119 = arith.subf %117, %118 : vector<1x64xf32>
    %120 = vector.broadcast %113 : vector<1x64xf32> to vector<16x64xf32>
    %121 = arith.subf %107, %120 : vector<16x64xf32>
    %cst_94 = arith.constant 9.99999974E-6 : f32
    %122 = vector.broadcast %cst_94 : f32 to vector<1x64xf32>
    %123 = arith.addf %119, %122 : vector<1x64xf32>
    %124 = math.rsqrt %123 : vector<1x64xf32>
    %125 = vector.broadcast %124 : vector<1x64xf32> to vector<16x64xf32>
    %126 = arith.mulf %121, %125 : vector<16x64xf32>
    %127 = vector.broadcast %109 : vector<1x64xf32> to vector<16x64xf32>
    %128 = arith.mulf %126, %127 : vector<16x64xf32>
    %129 = vector.broadcast %110 : vector<1x64xf32> to vector<16x64xf32>
    %130 = arith.addf %128, %129 : vector<16x64xf32>
    %cst_95 = arith.constant 0.000000e+00 : f32
    %131 = vector.broadcast %cst_95 : f32 to vector<16x64xf32>
    %132 = arith.maximumf %130, %131 : vector<16x64xf32>
    %c0_96 = arith.constant 0 : index
    %c0_97 = arith.constant 0 : index
    %133 = vector.load %arg7[%c0_96, %c0_97] : memref<64x64xf32, #tpu.memory_space<vmem>>, vector<64x64xf32>
    %c3_98 = arith.constant 3 : index
    %c0_99 = arith.constant 0 : index
    %134 = vector.load %arg8[%c3_98, %c0_99] : memref<5x64xf32, #tpu.memory_space<vmem>>, vector<1x64xf32>
    %c4_100 = arith.constant 4 : index
    %c0_101 = arith.constant 0 : index
    %135 = vector.load %arg8[%c4_100, %c0_101] : memref<5x64xf32, #tpu.memory_space<vmem>>, vector<1x64xf32>
    %cst_102 = arith.constant dense<0.000000e+00> : vector<64xf32>
    %136 = vector.multi_reduction <add>, %132, %cst_102 [0] : vector<16x64xf32> to vector<64xf32>
    %137 = vector.shape_cast %136 : vector<64xf32> to vector<1x64xf32>
    %cst_103 = arith.constant dense<0.000000e+00> : vector<1x64xf32>
    %138 = tpu.matmul %137, %133, %cst_103 {dimension_numbers = #tpu.dot_dimension_numbers<[1], [0], [0], [1], [0, 0, 1, 1], [], []>} : vector<1x64xf32>, vector<64x64xf32>, vector<1x64xf32> -> vector<1x64xf32>
    %139 = arith.mulf %132, %132 : vector<16x64xf32>
    %cst_104 = arith.constant dense<0.000000e+00> : vector<64xf32>
    %140 = vector.multi_reduction <add>, %139, %cst_104 [0] : vector<16x64xf32> to vector<64xf32>
    %141 = vector.shape_cast %140 : vector<64xf32> to vector<1x64xf32>
    %cst_105 = arith.constant dense<0.000000e+00> : vector<1x64xf32>
    %142 = tpu.matmul %141, %133, %cst_105 {dimension_numbers = #tpu.dot_dimension_numbers<[1], [0], [0], [1], [0, 0, 1, 1], [], []>} : vector<1x64xf32>, vector<64x64xf32>, vector<1x64xf32> -> vector<1x64xf32>
    %143 = arith.mulf %138, %138 : vector<1x64xf32>
    %144 = arith.subf %142, %143 : vector<1x64xf32>
    %145 = vector.broadcast %138 : vector<1x64xf32> to vector<16x64xf32>
    %146 = arith.subf %132, %145 : vector<16x64xf32>
    %cst_106 = arith.constant 9.99999974E-6 : f32
    %147 = vector.broadcast %cst_106 : f32 to vector<1x64xf32>
    %148 = arith.addf %144, %147 : vector<1x64xf32>
    %149 = math.rsqrt %148 : vector<1x64xf32>
    %150 = vector.broadcast %149 : vector<1x64xf32> to vector<16x64xf32>
    %151 = arith.mulf %146, %150 : vector<16x64xf32>
    %152 = vector.broadcast %134 : vector<1x64xf32> to vector<16x64xf32>
    %153 = arith.mulf %151, %152 : vector<16x64xf32>
    %154 = vector.broadcast %135 : vector<1x64xf32> to vector<16x64xf32>
    %155 = arith.addf %153, %154 : vector<16x64xf32>
    %cst_107 = arith.constant 0.000000e+00 : f32
    %156 = vector.broadcast %cst_107 : f32 to vector<16x64xf32>
    %157 = arith.maximumf %155, %156 : vector<16x64xf32>
    %cst_108 = arith.constant dense<0.000000e+00> : vector<64xf32>
    %158 = vector.multi_reduction <add>, %157, %cst_108 [0] : vector<16x64xf32> to vector<64xf32>
    %159 = vector.shape_cast %158 : vector<64xf32> to vector<1x64xf32>
    %cst_109 = arith.constant 6.250000e-02 : f32
    %160 = vector.broadcast %cst_109 : f32 to vector<1x64xf32>
    %161 = arith.mulf %159, %160 : vector<1x64xf32>
    %162 = vector.shape_cast %161 : vector<1x64xf32> to vector<1x1x64xf32>
    %c0_110 = arith.constant 0 : index
    %c0_111 = arith.constant 0 : index
    %c0_112 = arith.constant 0 : index
    %163 = vector.load %arg9[%c0_110, %c0_111, %c0_112] : memref<1x1x64xf32, #tpu.memory_space<vmem>>, vector<1x1x64xf32>
    tpu.vector_store %arg9[%c0_110, %c0_111, %c0_112], %162 {strides = array<i32>} : memref<1x1x64xf32, #tpu.memory_space<vmem>>, vector<1x1x64xf32>,
    return
  }
  func.func @transform_0(%arg0: i32) -> (i32, i32) {
    %c0_i32 = arith.constant 0 : i32
    %c0_i32_0 = arith.constant 0 : i32
    return %arg0, %c0_i32 : i32, i32
  }
  func.func @transform_1(%arg0: i32) -> (i32, i32) {
    %c0_i32 = arith.constant 0 : i32
    %c0_i32_0 = arith.constant 0 : i32
    %c0_i32_1 = arith.constant 0 : i32
    return %c0_i32, %c0_i32_0 : i32, i32
  }
  func.func @transform_2(%arg0: i32) -> (i32, i32) {
    %c0_i32 = arith.constant 0 : i32
    %c0_i32_0 = arith.constant 0 : i32
    %c0_i32_1 = arith.constant 0 : i32
    return %c0_i32, %c0_i32_0 : i32, i32
  }
  func.func @transform_3(%arg0: i32) -> (i32, i32) {
    %c0_i32 = arith.constant 0 : i32
    %c0_i32_0 = arith.constant 0 : i32
    %c0_i32_1 = arith.constant 0 : i32
    return %c0_i32, %c0_i32_0 : i32, i32
  }
  func.func @transform_4(%arg0: i32) -> (i32, i32, i32) {
    %c0_i32 = arith.constant 0 : i32
    %c0_i32_0 = arith.constant 0 : i32
    %c0_i32_1 = arith.constant 0 : i32
    %c0_i32_2 = arith.constant 0 : i32
    return %c0_i32, %c0_i32_0, %c0_i32_1 : i32, i32, i32
  }
  func.func @transform_5(%arg0: i32) -> (i32, i32, i32) {
    %c0_i32 = arith.constant 0 : i32
    %c0_i32_0 = arith.constant 0 : i32
    %c0_i32_1 = arith.constant 0 : i32
    %c0_i32_2 = arith.constant 0 : i32
    return %c0_i32, %c0_i32_0, %c0_i32_1 : i32, i32, i32
  }
  func.func @transform_6(%arg0: i32) -> (i32, i32) {
    %c0_i32 = arith.constant 0 : i32
    %c0_i32_0 = arith.constant 0 : i32
    %c0_i32_1 = arith.constant 0 : i32
    return %c0_i32, %c0_i32_0 : i32, i32
  }
  func.func @transform_7(%arg0: i32) -> (i32, i32) {
    %c0_i32 = arith.constant 0 : i32
    %c0_i32_0 = arith.constant 0 : i32
    %c0_i32_1 = arith.constant 0 : i32
    return %c0_i32, %c0_i32_0 : i32, i32
  }
  func.func @transform_8(%arg0: i32) -> (i32, i32, i32) {
    %c0_i32 = arith.constant 0 : i32
    %c0_i32_0 = arith.constant 0 : i32
    %c0_i32_1 = arith.constant 0 : i32
    return %arg0, %c0_i32, %c0_i32_0 : i32, i32, i32
  }
}

module attributes {stable_mosaic.version = 11 : i64} {
  func.func @_head_kernel(%arg0: i32, %arg1: memref<2x64xf32, #tpu.memory_space<vmem>>, %arg2: memref<64x32xbf16, #tpu.memory_space<vmem>>, %arg3: memref<32x32xbf16, #tpu.memory_space<vmem>>, %arg4: memref<32x16xbf16, #tpu.memory_space<vmem>>, %arg5: memref<16x32xbf16, #tpu.memory_space<vmem>>, %arg6: memref<32x16xbf16, #tpu.memory_space<vmem>>, %arg7: memref<32x2xbf16, #tpu.memory_space<vmem>>, %arg8: memref<7x32xf32, #tpu.memory_space<vmem>>, %arg9: memref<2x16xf32, #tpu.memory_space<vmem>>, %arg10: memref<1x2xf32, #tpu.memory_space<vmem>>, %arg11: memref<32x32xf32, #tpu.memory_space<vmem>>, %arg12: memref<2x32xf32, #tpu.memory_space<vmem>>, %arg13: memref<2x16xf32, #tpu.memory_space<vmem>>, %arg14: memref<2x16xf32, #tpu.memory_space<vmem>>, %arg15: memref<2x2xf32, #tpu.memory_space<vmem>>) attributes {dimension_semantics = [#tpu.dimension_semantics<arbitrary>], iteration_bounds = array<i64: 1>, scalar_prefetch = 0 : i64, scratch_operands = 0 : i64, tpu.core_type = #tpu.core_type<tc>, window_params = [{pipeline_mode = #tpu.pipeline_mode<synchronous>, transform_indices = @transform_0, window_bounds = array<i64: 2, 64>}, {pipeline_mode = #tpu.pipeline_mode<synchronous>, transform_indices = @transform_1, window_bounds = array<i64: 64, 32>}, {pipeline_mode = #tpu.pipeline_mode<synchronous>, transform_indices = @transform_2, window_bounds = array<i64: 32, 32>}, {pipeline_mode = #tpu.pipeline_mode<synchronous>, transform_indices = @transform_3, window_bounds = array<i64: 32, 16>}, {pipeline_mode = #tpu.pipeline_mode<synchronous>, transform_indices = @transform_4, window_bounds = array<i64: 16, 32>}, {pipeline_mode = #tpu.pipeline_mode<synchronous>, transform_indices = @transform_5, window_bounds = array<i64: 32, 16>}, {pipeline_mode = #tpu.pipeline_mode<synchronous>, transform_indices = @transform_6, window_bounds = array<i64: 32, 2>}, {pipeline_mode = #tpu.pipeline_mode<synchronous>, transform_indices = @transform_7, window_bounds = array<i64: 7, 32>}, {pipeline_mode = #tpu.pipeline_mode<synchronous>, transform_indices = @transform_8, window_bounds = array<i64: 2, 16>}, {pipeline_mode = #tpu.pipeline_mode<synchronous>, transform_indices = @transform_9, window_bounds = array<i64: 1, 2>}, {pipeline_mode = #tpu.pipeline_mode<synchronous>, transform_indices = @transform_10, window_bounds = array<i64: 32, 32>}, {pipeline_mode = #tpu.pipeline_mode<synchronous>, transform_indices = @transform_11, window_bounds = array<i64: 2, 32>}, {pipeline_mode = #tpu.pipeline_mode<synchronous>, transform_indices = @transform_12, window_bounds = array<i64: 2, 16>}, {pipeline_mode = #tpu.pipeline_mode<synchronous>, transform_indices = @transform_13, window_bounds = array<i64: 2, 16>}, {pipeline_mode = #tpu.pipeline_mode<synchronous>, transform_indices = @transform_14, window_bounds = array<i64: 2, 2>}]} {
    %c0 = arith.constant 0 : index
    %c0_0 = arith.constant 0 : index
    %0 = vector.load %arg11[%c0, %c0_0] : memref<32x32xf32, #tpu.memory_space<vmem>>, vector<32x32xf32>
    %c0_1 = arith.constant 0 : index
    %c0_2 = arith.constant 0 : index
    %1 = vector.load %arg1[%c0_1, %c0_2] : memref<2x64xf32, #tpu.memory_space<vmem>>, vector<2x64xf32>
    %2 = arith.truncf %1 : vector<2x64xf32> to vector<2x64xbf16>
    %c0_3 = arith.constant 0 : index
    %c0_4 = arith.constant 0 : index
    %3 = vector.load %arg2[%c0_3, %c0_4] : memref<64x32xbf16, #tpu.memory_space<vmem>>, vector<64x32xbf16>
    %cst = arith.constant dense<0.000000e+00> : vector<2x32xf32>
    %4 = tpu.matmul %2, %3, %cst {dimension_numbers = #tpu.dot_dimension_numbers<[1], [0], [0], [1], [0, 0, 1, 1], [], []>} : vector<2x64xbf16>, vector<64x32xbf16>, vector<2x32xf32> -> vector<2x32xf32>
    %c0_5 = arith.constant 0 : index
    %c0_6 = arith.constant 0 : index
    %5 = vector.load %arg8[%c0_5, %c0_6] : memref<7x32xf32, #tpu.memory_space<vmem>>, vector<1x32xf32>
    %6 = vector.broadcast %5 : vector<1x32xf32> to vector<2x32xf32>
    %7 = arith.addf %4, %6 : vector<2x32xf32>
    %cst_7 = arith.constant 0.000000e+00 : f32
    %8 = vector.broadcast %cst_7 : f32 to vector<2x32xf32>
    %9 = arith.maximumf %7, %8 : vector<2x32xf32>
    %10 = arith.truncf %9 : vector<2x32xf32> to vector<2x32xbf16>
    %c0_8 = arith.constant 0 : index
    %c0_9 = arith.constant 0 : index
    %11 = vector.load %arg3[%c0_8, %c0_9] : memref<32x32xbf16, #tpu.memory_space<vmem>>, vector<32x32xbf16>
    %cst_10 = arith.constant dense<0.000000e+00> : vector<2x32xf32>
    %12 = tpu.matmul %10, %11, %cst_10 {dimension_numbers = #tpu.dot_dimension_numbers<[1], [0], [0], [1], [0, 0, 1, 1], [], []>} : vector<2x32xbf16>, vector<32x32xbf16>, vector<2x32xf32> -> vector<2x32xf32>
    %c1 = arith.constant 1 : index
    %c0_11 = arith.constant 0 : index
    %13 = vector.load %arg8[%c1, %c0_11] : memref<7x32xf32, #tpu.memory_space<vmem>>, vector<1x32xf32>
    %14 = vector.broadcast %13 : vector<1x32xf32> to vector<2x32xf32>
    %15 = arith.addf %12, %14 : vector<2x32xf32>
    %c2 = arith.constant 2 : index
    %c0_12 = arith.constant 0 : index
    %16 = vector.load %arg8[%c2, %c0_12] : memref<7x32xf32, #tpu.memory_space<vmem>>, vector<1x32xf32>
    %c3 = arith.constant 3 : index
    %c0_13 = arith.constant 0 : index
    %17 = vector.load %arg8[%c3, %c0_13] : memref<7x32xf32, #tpu.memory_space<vmem>>, vector<1x32xf32>
    %cst_14 = arith.constant dense<0.000000e+00> : vector<2x32xf32>
    %18 = tpu.matmul %15, %0, %cst_14 {dimension_numbers = #tpu.dot_dimension_numbers<[1], [0], [0], [1], [0, 0, 1, 1], [], []>} : vector<2x32xf32>, vector<32x32xf32>, vector<2x32xf32> -> vector<2x32xf32>
    %19 = arith.mulf %15, %15 : vector<2x32xf32>
    %cst_15 = arith.constant dense<0.000000e+00> : vector<2x32xf32>
    %20 = tpu.matmul %19, %0, %cst_15 {dimension_numbers = #tpu.dot_dimension_numbers<[1], [0], [0], [1], [0, 0, 1, 1], [], []>} : vector<2x32xf32>, vector<32x32xf32>, vector<2x32xf32> -> vector<2x32xf32>
    %21 = arith.mulf %18, %18 : vector<2x32xf32>
    %22 = arith.subf %20, %21 : vector<2x32xf32>
    %23 = arith.subf %15, %18 : vector<2x32xf32>
    %cst_16 = arith.constant 9.99999974E-6 : f32
    %24 = vector.broadcast %cst_16 : f32 to vector<2x32xf32>
    %25 = arith.addf %22, %24 : vector<2x32xf32>
    %26 = math.rsqrt %25 : vector<2x32xf32>
    %27 = arith.mulf %23, %26 : vector<2x32xf32>
    %28 = vector.broadcast %16 : vector<1x32xf32> to vector<2x32xf32>
    %29 = arith.mulf %27, %28 : vector<2x32xf32>
    %30 = vector.broadcast %17 : vector<1x32xf32> to vector<2x32xf32>
    %31 = arith.addf %29, %30 : vector<2x32xf32>
    %cst_17 = arith.constant 0.000000e+00 : f32
    %32 = vector.broadcast %cst_17 : f32 to vector<2x32xf32>
    %33 = arith.maximumf %31, %32 : vector<2x32xf32>
    %34 = arith.truncf %33 : vector<2x32xf32> to vector<2x32xbf16>
    %c0_18 = arith.constant 0 : index
    %c0_19 = arith.constant 0 : index
    %35 = vector.load %arg4[%c0_18, %c0_19] : memref<32x16xbf16, #tpu.memory_space<vmem>>, vector<32x16xbf16>
    %cst_20 = arith.constant dense<0.000000e+00> : vector<2x16xf32>
    %36 = tpu.matmul %34, %35, %cst_20 {dimension_numbers = #tpu.dot_dimension_numbers<[1], [0], [0], [1], [0, 0, 1, 1], [], []>} : vector<2x32xbf16>, vector<32x16xbf16>, vector<2x16xf32> -> vector<2x16xf32>
    %c0_21 = arith.constant 0 : index
    %c0_22 = arith.constant 0 : index
    %37 = vector.load %arg9[%c0_21, %c0_22] : memref<2x16xf32, #tpu.memory_space<vmem>>, vector<1x16xf32>
    %38 = vector.broadcast %37 : vector<1x16xf32> to vector<2x16xf32>
    %39 = arith.addf %36, %38 : vector<2x16xf32>
    %40 = arith.truncf %39 : vector<2x16xf32> to vector<2x16xbf16>
    %c0_23 = arith.constant 0 : index
    %c0_24 = arith.constant 0 : index
    %41 = vector.load %arg5[%c0_23, %c0_24] : memref<16x32xbf16, #tpu.memory_space<vmem>>, vector<16x32xbf16>
    %cst_25 = arith.constant dense<0.000000e+00> : vector<2x32xf32>
    %42 = tpu.matmul %40, %41, %cst_25 {dimension_numbers = #tpu.dot_dimension_numbers<[1], [0], [0], [1], [0, 0, 1, 1], [], []>} : vector<2x16xbf16>, vector<16x32xbf16>, vector<2x32xf32> -> vector<2x32xf32>
    %c4 = arith.constant 4 : index
    %c0_26 = arith.constant 0 : index
    %43 = vector.load %arg8[%c4, %c0_26] : memref<7x32xf32, #tpu.memory_space<vmem>>, vector<1x32xf32>
    %44 = vector.broadcast %43 : vector<1x32xf32> to vector<2x32xf32>
    %45 = arith.addf %42, %44 : vector<2x32xf32>
    %c5 = arith.constant 5 : index
    %c0_27 = arith.constant 0 : index
    %46 = vector.load %arg8[%c5, %c0_27] : memref<7x32xf32, #tpu.memory_space<vmem>>, vector<1x32xf32>
    %c6 = arith.constant 6 : index
    %c0_28 = arith.constant 0 : index
    %47 = vector.load %arg8[%c6, %c0_28] : memref<7x32xf32, #tpu.memory_space<vmem>>, vector<1x32xf32>
    %cst_29 = arith.constant dense<0.000000e+00> : vector<2x32xf32>
    %48 = tpu.matmul %45, %0, %cst_29 {dimension_numbers = #tpu.dot_dimension_numbers<[1], [0], [0], [1], [0, 0, 1, 1], [], []>} : vector<2x32xf32>, vector<32x32xf32>, vector<2x32xf32> -> vector<2x32xf32>
    %49 = arith.mulf %45, %45 : vector<2x32xf32>
    %cst_30 = arith.constant dense<0.000000e+00> : vector<2x32xf32>
    %50 = tpu.matmul %49, %0, %cst_30 {dimension_numbers = #tpu.dot_dimension_numbers<[1], [0], [0], [1], [0, 0, 1, 1], [], []>} : vector<2x32xf32>, vector<32x32xf32>, vector<2x32xf32> -> vector<2x32xf32>
    %51 = arith.mulf %48, %48 : vector<2x32xf32>
    %52 = arith.subf %50, %51 : vector<2x32xf32>
    %53 = arith.subf %45, %48 : vector<2x32xf32>
    %cst_31 = arith.constant 9.99999974E-6 : f32
    %54 = vector.broadcast %cst_31 : f32 to vector<2x32xf32>
    %55 = arith.addf %52, %54 : vector<2x32xf32>
    %56 = math.rsqrt %55 : vector<2x32xf32>
    %57 = arith.mulf %53, %56 : vector<2x32xf32>
    %58 = vector.broadcast %46 : vector<1x32xf32> to vector<2x32xf32>
    %59 = arith.mulf %57, %58 : vector<2x32xf32>
    %60 = vector.broadcast %47 : vector<1x32xf32> to vector<2x32xf32>
    %61 = arith.addf %59, %60 : vector<2x32xf32>
    %cst_32 = arith.constant 0.000000e+00 : f32
    %62 = vector.broadcast %cst_32 : f32 to vector<2x32xf32>
    %63 = arith.maximumf %61, %62 : vector<2x32xf32>
    %64 = arith.truncf %63 : vector<2x32xf32> to vector<2x32xbf16>
    %c0_33 = arith.constant 0 : index
    %c0_34 = arith.constant 0 : index
    %65 = vector.load %arg6[%c0_33, %c0_34] : memref<32x16xbf16, #tpu.memory_space<vmem>>, vector<32x16xbf16>
    %cst_35 = arith.constant dense<0.000000e+00> : vector<2x16xf32>
    %66 = tpu.matmul %64, %65, %cst_35 {dimension_numbers = #tpu.dot_dimension_numbers<[1], [0], [0], [1], [0, 0, 1, 1], [], []>} : vector<2x32xbf16>, vector<32x16xbf16>, vector<2x16xf32> -> vector<2x16xf32>
    %c1_36 = arith.constant 1 : index
    %c0_37 = arith.constant 0 : index
    %67 = vector.load %arg9[%c1_36, %c0_37] : memref<2x16xf32, #tpu.memory_space<vmem>>, vector<1x16xf32>
    %68 = vector.broadcast %67 : vector<1x16xf32> to vector<2x16xf32>
    %69 = arith.addf %66, %68 : vector<2x16xf32>
    %c0_38 = arith.constant 0 : index
    %c0_39 = arith.constant 0 : index
    %70 = vector.load %arg7[%c0_38, %c0_39] : memref<32x2xbf16, #tpu.memory_space<vmem>>, vector<32x2xbf16>
    %cst_40 = arith.constant dense<0.000000e+00> : vector<2x2xf32>
    %71 = tpu.matmul %10, %70, %cst_40 {dimension_numbers = #tpu.dot_dimension_numbers<[1], [0], [0], [1], [0, 0, 1, 1], [], []>} : vector<2x32xbf16>, vector<32x2xbf16>, vector<2x2xf32> -> vector<2x2xf32>
    %c0_41 = arith.constant 0 : index
    %c0_42 = arith.constant 0 : index
    %72 = vector.load %arg10[%c0_41, %c0_42] : memref<1x2xf32, #tpu.memory_space<vmem>>, vector<1x2xf32>
    %73 = vector.broadcast %72 : vector<1x2xf32> to vector<2x2xf32>
    %74 = arith.addf %71, %73 : vector<2x2xf32>
    %cst_43 = arith.constant dense<0xFF800000> : vector<2xf32>
    %75 = vector.multi_reduction <maximumf>, %74, %cst_43 [1] : vector<2x2xf32> to vector<2xf32>
    %76 = vector.shape_cast %75 : vector<2xf32> to vector<2x1xf32>
    %77 = vector.broadcast %76 : vector<2x1xf32> to vector<2x2xf32>
    %78 = arith.subf %74, %77 : vector<2x2xf32>
    %79 = math.exp %78 : vector<2x2xf32>
    %cst_44 = arith.constant dense<0.000000e+00> : vector<2xf32>
    %80 = vector.multi_reduction <add>, %79, %cst_44 [1] : vector<2x2xf32> to vector<2xf32>
    %81 = vector.shape_cast %80 : vector<2xf32> to vector<2x1xf32>
    %82 = vector.broadcast %81 : vector<2x1xf32> to vector<2x2xf32>
    %83 = arith.divf %79, %82 : vector<2x2xf32>
    %c0_45 = arith.constant 0 : index
    %c0_46 = arith.constant 0 : index
    %84 = vector.load %arg12[%c0_45, %c0_46] : memref<2x32xf32, #tpu.memory_space<vmem>>, vector<2x32xf32>
    tpu.vector_store %arg12[%c0_45, %c0_46], %9 {strides = array<i32>} : memref<2x32xf32, #tpu.memory_space<vmem>>, vector<2x32xf32>,
    %c0_47 = arith.constant 0 : index
    %c0_48 = arith.constant 0 : index
    %85 = vector.load %arg13[%c0_47, %c0_48] : memref<2x16xf32, #tpu.memory_space<vmem>>, vector<2x16xf32>
    tpu.vector_store %arg13[%c0_47, %c0_48], %39 {strides = array<i32>} : memref<2x16xf32, #tpu.memory_space<vmem>>, vector<2x16xf32>,
    %c0_49 = arith.constant 0 : index
    %c0_50 = arith.constant 0 : index
    %86 = vector.load %arg14[%c0_49, %c0_50] : memref<2x16xf32, #tpu.memory_space<vmem>>, vector<2x16xf32>
    tpu.vector_store %arg14[%c0_49, %c0_50], %69 {strides = array<i32>} : memref<2x16xf32, #tpu.memory_space<vmem>>, vector<2x16xf32>,
    %c0_51 = arith.constant 0 : index
    %c0_52 = arith.constant 0 : index
    %87 = vector.load %arg15[%c0_51, %c0_52] : memref<2x2xf32, #tpu.memory_space<vmem>>, vector<2x2xf32>
    tpu.vector_store %arg15[%c0_51, %c0_52], %83 {strides = array<i32>} : memref<2x2xf32, #tpu.memory_space<vmem>>, vector<2x2xf32>,
    return
  }
  func.func @transform_0(%arg0: i32) -> (i32, i32) {
    %c0_i32 = arith.constant 0 : i32
    %c0_i32_0 = arith.constant 0 : i32
    %c0_i32_1 = arith.constant 0 : i32
    return %c0_i32, %c0_i32_0 : i32, i32
  }
  func.func @transform_1(%arg0: i32) -> (i32, i32) {
    %c0_i32 = arith.constant 0 : i32
    %c0_i32_0 = arith.constant 0 : i32
    %c0_i32_1 = arith.constant 0 : i32
    return %c0_i32, %c0_i32_0 : i32, i32
  }
  func.func @transform_2(%arg0: i32) -> (i32, i32) {
    %c0_i32 = arith.constant 0 : i32
    %c0_i32_0 = arith.constant 0 : i32
    %c0_i32_1 = arith.constant 0 : i32
    return %c0_i32, %c0_i32_0 : i32, i32
  }
  func.func @transform_3(%arg0: i32) -> (i32, i32) {
    %c0_i32 = arith.constant 0 : i32
    %c0_i32_0 = arith.constant 0 : i32
    %c0_i32_1 = arith.constant 0 : i32
    return %c0_i32, %c0_i32_0 : i32, i32
  }
  func.func @transform_4(%arg0: i32) -> (i32, i32) {
    %c0_i32 = arith.constant 0 : i32
    %c0_i32_0 = arith.constant 0 : i32
    %c0_i32_1 = arith.constant 0 : i32
    return %c0_i32, %c0_i32_0 : i32, i32
  }
  func.func @transform_5(%arg0: i32) -> (i32, i32) {
    %c0_i32 = arith.constant 0 : i32
    %c0_i32_0 = arith.constant 0 : i32
    %c0_i32_1 = arith.constant 0 : i32
    return %c0_i32, %c0_i32_0 : i32, i32
  }
  func.func @transform_6(%arg0: i32) -> (i32, i32) {
    %c0_i32 = arith.constant 0 : i32
    %c0_i32_0 = arith.constant 0 : i32
    %c0_i32_1 = arith.constant 0 : i32
    return %c0_i32, %c0_i32_0 : i32, i32
  }
  func.func @transform_7(%arg0: i32) -> (i32, i32) {
    %c0_i32 = arith.constant 0 : i32
    %c0_i32_0 = arith.constant 0 : i32
    %c0_i32_1 = arith.constant 0 : i32
    return %c0_i32, %c0_i32_0 : i32, i32
  }
  func.func @transform_8(%arg0: i32) -> (i32, i32) {
    %c0_i32 = arith.constant 0 : i32
    %c0_i32_0 = arith.constant 0 : i32
    %c0_i32_1 = arith.constant 0 : i32
    return %c0_i32, %c0_i32_0 : i32, i32
  }
  func.func @transform_9(%arg0: i32) -> (i32, i32) {
    %c0_i32 = arith.constant 0 : i32
    %c0_i32_0 = arith.constant 0 : i32
    %c0_i32_1 = arith.constant 0 : i32
    return %c0_i32, %c0_i32_0 : i32, i32
  }
  func.func @transform_10(%arg0: i32) -> (i32, i32) {
    %c0_i32 = arith.constant 0 : i32
    %c0_i32_0 = arith.constant 0 : i32
    %c0_i32_1 = arith.constant 0 : i32
    return %c0_i32, %c0_i32_0 : i32, i32
  }
  func.func @transform_11(%arg0: i32) -> (i32, i32) {
    %c0_i32 = arith.constant 0 : i32
    %c0_i32_0 = arith.constant 0 : i32
    %c0_i32_1 = arith.constant 0 : i32
    return %c0_i32, %c0_i32_0 : i32, i32
  }
  func.func @transform_12(%arg0: i32) -> (i32, i32) {
    %c0_i32 = arith.constant 0 : i32
    %c0_i32_0 = arith.constant 0 : i32
    %c0_i32_1 = arith.constant 0 : i32
    return %c0_i32, %c0_i32_0 : i32, i32
  }
  func.func @transform_13(%arg0: i32) -> (i32, i32) {
    %c0_i32 = arith.constant 0 : i32
    %c0_i32_0 = arith.constant 0 : i32
    %c0_i32_1 = arith.constant 0 : i32
    return %c0_i32, %c0_i32_0 : i32, i32
  }
  func.func @transform_14(%arg0: i32) -> (i32, i32) {
    %c0_i32 = arith.constant 0 : i32
    %c0_i32_0 = arith.constant 0 : i32
    %c0_i32_1 = arith.constant 0 : i32
    return %c0_i32, %c0_i32_0 : i32, i32
  }
}

</mosaic_0001>

<bundles_post_ra>
// kernel: yshape_forward.3
= control target key start
LH: loop header
LB: loop body
LE: loop exit
PB: predicated region body
PF: predicated region fallthrough
CT: control target
= control target key end

     0   :  { %20 = vsyncpa [#allocation3], 0  ;;  %s1456_s0 = inlined_call_operand.vmem [shape: f32[2,64], index: 0, kind: input, shape index: {}]   ;;  %s1457_s1 = inlined_call_operand.vmem [shape: bf16[64,32], index: 1, kind: input, shape index: {}]   ;;  %s1458_s2 = inlined_call_operand.vmem [shape: bf16[32,32], index: 2, kind: input, shape index: {}]   ;;  %s1459_s3 = inlined_call_operand.vmem [shape: bf16[32,16], index: 3, kind: input, shape index: {}]   ;;  %s1460_s4 = inlined_call_operand.vmem [shape: bf16[16,32], index: 4, kind: input, shape index: {}]   ;;  %s1461_s5 = inlined_call_operand.vmem [shape: bf16[32,16], index: 5, kind: input, shape index: {}]   ;;  %s1462_s6 = inlined_call_operand.vmem [shape: bf16[32,2], index: 6, kind: input, shape index: {}]   ;;  %s1463_s7 = inlined_call_operand.vmem [shape: f32[7,32], index: 7, kind: input, shape index: {}]   ;;  %s1464_s8 = inlined_call_operand.vmem [shape: f32[2,16], index: 8, kind: input, shape index: {}]   ;;  %s1465_s9 = inlined_call_operand.vmem [shape: f32[1,2], index: 9, kind: input, shape index: {}]   ;;  %s1466_s10 = inlined_call_operand.vmem [shape: f32[32,32], index: 10, kind: input, shape index: {}]   ;;  %s1467_s11 = inlined_call_operand.hbm [shape: f32[2,32], index: 11, kind: output, shape index: {0}]   ;;  %s1468_s12 = inlined_call_operand.hbm [shape: f32[2,16], index: 12, kind: output, shape index: {1}]   ;;  %s1469_s13 = inlined_call_operand.hbm [shape: f32[2,16], index: 13, kind: output, shape index: {2}]   ;;  %s1470_s14 = inlined_call_operand.hbm [shape: f32[2,2], index: 14, kind: output, shape index: {3}]  }
   0x1   :  { %21 = vsyncpa [#allocation5], 0  ;;  %v1053_v0 = vld [vmem:[%s1457_s1] sm:$0xff]   ;;  %v1168_v1 = vmov 0.0   ;;  %v1054_v2 = vld [vmem:[%s1457_s1 + $0x8] sm:$0xff]   ;;  %vm1169_vm0 = vmmov 0  }
   0x2   :  { %928 = vmatprep.subr.bf16.mxu0 %v1168_v1  ;;  %940 = vmatprep.subr.bf16.mxu1 %v1168_v1  ;;  %v1055_v3 = vld [vmem:[%s1457_s1 + $0x10] sm:$0xff]   ;;  %v1056_v4 = vld [vmem:[%s1457_s1 + $0x18] sm:$0xff]   ;;  %v50_v5 = vld [vmem:[%s1456_s0] sm:$0x3] }
   0x3   :  { %929 = vmatpush3.bf16.msra.mxu0 %v1053_v0  ;;  %936 = vmatprep.mubr.msk.bf16.mxu0 %vm1169_vm0, %v1168_v1 }
   0x4   :  { %930 = vmatprep.subr.bf16.mxu0 %v1168_v1  ;;  %944 = vmatprep.mubr.msk.bf16.mxu1 %vm1169_vm0, %v1168_v1 }
   0x7   :  { %931 = vmatpush3.bf16.msra.mxu0 %v1054_v2 }
   0x8   :  { %932 = vmatprep.subr.bf16.mxu0 %v1168_v1 }
   0xb   :  { %933 = vmatpush3.bf16.msra.mxu0 %v1055_v3 }
   0xc   :  { %22 = vsyncpa [#allocation8], 0  ;;  %934 = vmatprep.subr.bf16.mxu0 %v1168_v1  ;;  %v51_v6 = vpack.c.bf16 %v50_v5, %v50_v5  ;;  %vm89_vm1 = vcmask 523264   ;;  %v1057_v7 = vld [vmem:[%s1458_s2] sm:$0xff]   ;;  %v1058_v8 = vld [vmem:[%s1458_s2 + $0x8] sm:$0xff]   ;;  %v1170_v11 = vmov 0.0|0.0  }
   0xd   :  { %941 = vmatpush3.bf16.msra.mxu1 %v1057_v7  ;;  %v46_v9 = vld [vmem:[%s1466_s10] sm:$0xff]  ;;  %v47_v10 = vld [vmem:[%s1466_s10 + $0x8] sm:$0xff]  ;;  %v48_v13 = vld [vmem:[%s1466_s10 + $0x10] sm:$0xff]  ;;  %vm795_vm2 = vcmask 254976   ;;  %vm156_vm3 = vcmask 261120   ;;  %vm797_vm4 = vcmask 123904  }
   0xe   :  { %942 = vmatprep.subr.bf16.mxu1 %v1168_v1  ;;  %v1290_v12 = vpack.c.bf16 %v47_v10, %v46_v9  ;;  %v49_v14 = vld [vmem:[%s1466_s10 + $0x18] sm:$0xff]  ;;  %v856_v16 = vld [vmem:[%s1463_s7] ss:$0 sm:$0xff]  ;;  %v862_v24 = vld [vmem:[%s1463_s7 + $0x1] ss:$0 sm:$0xff]  ;;  %vm445_vm5 = vcmask 130048  }
   0xf   :  { %935 = vmatpush3.bf16.msra.mxu0 %v1056_v4  ;;  %v1301_v15 = vpack.c.bf16 %v49_v14, %v48_v13  ;;  %v1059_v31 = vld [vmem:[%s1459_s3] sm:$0xff]   ;;  %v1060_v32 = vld [vmem:[%s1459_s3 + $0x8] sm:$0xff]   ;;  %vm783_vm6 = vcmask 9216   ;;  %s1172_s24 = smov [#allocation2]  }
  0x10   :  { %1028 = vmatprep.subr.bf16.mxu0 %v1170_v11  ;;  %v868_v42 = vld [vmem:[%s1463_s7 + $0x2] ss:$0 sm:$0xff]  ;;  %v869_v44 = vld [vmem:[%s1463_s7 + $0x3] ss:$0 sm:$0xff]  ;;  %v870_v50 = vld [vmem:[%s1464_s8] ss:$0 sm:$0xff] }
  0x11   :  { %943 = vmatpush3.bf16.msra.mxu1 %v1058_v8  ;;  %v1061_v49 = vld [vmem:[%s1460_s4] sm:$0xff]   ;;  %v1063_v2 = vld [vmem:[%s1462_s6 + $0x8] sm:$0xff]  }
  0x12   :  { %937 = vmatmul.mubr.msk.bf16.vlgmr.msra.gmra.mrb[0].mxu0 %vm89_vm1, %v51_v6  ;;  %1022 = vmatprep.subr.bf16.mxu1 %v1170_v11  ;;  %v874_v57 = vld [vmem:[%s1463_s7 + $0x4] ss:$0 sm:$0xff]  ;;  %v1065_v4 = vld [vmem:[%s1461_s5 + $0x8] sm:$0xff]  }
  0x13   :  { %967 = vmatprep.mubr.msk.f32.mxu0 %vm1169_vm0, %v1168_v1  ;;  %1030 = vmatpush3.bf16.msra.mxu0 %v1290_v12  ;;  %v1062_v62 = vld [vmem:[%s1462_s6] sm:$0xff]  }
  0x14   :  { %1031 = vmatprep.subr.bf16.mxu0 %v1170_v11  ;;  %v1064_v3 = vld [vmem:[%s1461_s5] sm:$0xff]  }
  0x17   :  { %1033 = vmatpush3.bf16.msra.mxu0 %v1301_v15 }
  0x18   :  { %978 = vmatprep.subr.bf16.mxu0 %v1168_v1 }
  0xe5   :  { %v127_v17 = vpop.f32.mrb[0].mxu0 }
  0xe6   :  { %v128_v18 = vadd.f32 %v856_v16, %v127_v17  ;;  %v938_v19 = vpop.f32.mrb[1].mxu0 }
  0xe7   :  { %v130_v20 = vpop.f32.mrb[2].mxu0 }
  0xe8   :  { %v133_v21 = vmax.f32 %v128_v18, 0.0  ;;  %v939_v22 = vpop.f32.mrb[3].mxu0  ;;  %v879_v20 = vld [vmem:[%s1463_s7 + $0x5] ss:$0 sm:$0xff] }
  0xe9   :  { %v880_v22 = vld [vmem:[%s1463_s7 + $0x6] ss:$0 sm:$0xff]  ;;  %s807_s7 = sshll.u32 %s1172_s24, 4  ;;  %s808_s7 = int_to_ptr.vmem [resolvable:$true] %s807_s7 }
  0xea   :  { %v1308_v23 = vpack.c.bf16 %v133_v21, %v133_v21  ;;  %796 = vst.msk [vmem:[#allocation2] sm:$0x3] %vm795_vm2, %v133_v21 }
  0xec   :  { %945 = vmatmul.mubr.msk.bf16.vlgmr.msra.gmra.mrb[0].mxu1 %vm156_vm3, %v1308_v23 }
  0xed   :  { %1024 = vmatpush3.bf16.msra.mxu1 %v1290_v12  ;;  %956 = vmatprep.mubr.msk.f32.mxu1 %vm1169_vm0, %v1168_v1 }
  0xee   :  { %1025 = vmatprep.subr.bf16.mxu1 %v1170_v11 }
  0xf1   :  { %1027 = vmatpush3.bf16.msra.mxu1 %v1301_v15 }
  0xf2   :  { %970 = vmatprep.subr.bf16.mxu1 %v1168_v1 }
 0x1bf   :  { %v194_v25 = vpop.f32.mrb[0].mxu1 }
 0x1c0   :  { %v195_v26 = vadd.f32 %v862_v24, %v194_v25  ;;  %v946_v27 = vpop.f32.mrb[1].mxu1 }
 0x1c1   :  { %v197_v28 = vpop.f32.mrb[2].mxu1 }
 0x1c2   :  { %v275_v29 = vmul.f32 %v195_v26, %v195_v26  ;;  %v947_v30 = vpop.f32.mrb[3].mxu1  ;;  %957 = vmatmul.mubr.msk.f32.vlgmr.msra.gmra.mrb[4].mxu1 %vm156_vm3, %v195_v26 }
 0x1c3   :  { %974 = vmatprep.mubr.msk.bf16.mxu1 %vm1169_vm0, %v1168_v1  ;;  %971 = vmatpush3.bf16.msra.mxu1 %v1059_v31 }
 0x1c4   :  { %968 = vmatmul.mubr.msk.f32.vlgmr.msra.gmra.mrb[4].mxu0 %vm156_vm3, %v275_v29  ;;  %972 = vmatprep.subr.bf16.mxu1 %v1168_v1 }
 0x1c5   :  { %980 = vmatprep.mubr.msk.bf16.mxu0 %vm1169_vm0, %v1168_v1  ;;  %979 = vmatpush3.bf16.msra.mxu0 %v1061_v49 }
 0x1c6   :  { %1040 = vmatprep.subr.bf16.mxu0 %v1170_v11 }
 0x1c7   :  { %973 = vmatpush3.bf16.msra.mxu1 %v1060_v32 }
 0x1c8   :  { %1034 = vmatprep.subr.bf16.mxu1 %v1170_v11 }
 0x295   :  { %v271_v33 = vpop.f32.mrb[4].mxu1 }
 0x296   :  { %v349_v34 = vmul.f32 %v271_v33, %v271_v33  ;;  %v958_v35 = vpop.f32.mrb[5].mxu1  ;;  %v351_v40 = vsub.f32 %v195_v26, %v271_v33 }
 0x297   :  { %v345_v36 = vpop.f32.mrb[4].mxu0 }
 0x298   :  { %v350_v37 = vsub.f32 %v345_v36, %v349_v34  ;;  %v969_v38 = vpop.f32.mrb[5].mxu0 }
 0x29a   :  { %v352_v39 = vadd.f32 1e-05, %v350_v37 }
 0x29c   :  { %1066 = vrsqrt.f32 %v352_v39 }
 0x2a6   :  { %v1067_v41 = vpop.eup %1066 }
 0x2a7   :  { %v354_v43 = vmul.f32 %v1067_v41, %v351_v40 }
 0x2a9   :  { %v359_v45 = vmul.f32 %v868_v42, %v354_v43 }
 0x2ab   :  { %v364_v46 = vadd.f32 %v869_v44, %v359_v45 }
 0x2ad   :  { %v365_v47 = vmax.f32 %v364_v46, 0.0 }
 0x2af   :  { %v366_v48 = vpack.c.bf16 %v365_v47, %v365_v47 }
 0x2b1   :  { %975 = vmatmul.mubr.msk.bf16.vlgmr.msra.gmra.mrb[8].mxu1 %vm156_vm3, %v366_v48 }
 0x2b2   :  { %1036 = vmatpush3.bf16.msra.mxu1 %v1290_v12  ;;  %992 = vmatprep.mubr.msk.f32.mxu1 %vm1169_vm0, %v1168_v1 }
 0x2b3   :  { %1037 = vmatprep.subr.bf16.mxu1 %v1170_v11 }
 0x2b6   :  { %1039 = vmatpush3.bf16.msra.mxu1 %v1301_v15 }
 0x2b7   :  { %1006 = vmatprep.subr.bf16.mxu1 %v1168_v1 }
 0x384   :  { %v425_v51 = vpop.f32.mrb[8].mxu1 }
 0x385   :  { %v426_v52 = vadd.f32 %v870_v50, %v425_v51  ;;  %v976_v53 = vpop.f32.mrb[9].mxu1 }
 0x386   :  { %v428_v54 = vpop.f32.mrb[10].mxu1 }
 0x387   :  { %v431_v55 = vpack.c.bf16 %v426_v52, %v426_v52  ;;  %v977_v56 = vpop.f32.mrb[11].mxu1  ;;  %798 = vst.msk [vmem:[#allocation4] sm:$0x3] %vm797_vm4, %v426_v52 }
 0x389   :  { %981 = vmatmul.mubr.msk.bf16.vlgmr.msra.gmra.mrb[8].mxu0 %vm445_vm5, %v431_v55 }
 0x38a   :  { %1042 = vmatpush3.bf16.msra.mxu0 %v1290_v12  ;;  %1003 = vmatprep.mubr.msk.f32.mxu0 %vm1169_vm0, %v1168_v1  ;;  %v885_v12 = vld [vmem:[%s1465_s9] ss:$0 sm:$0xff]  ;;  %s1171_s9 = smov [#allocation4]  }
 0x38b   :  { %1043 = vmatprep.subr.bf16.mxu0 %v1170_v11  ;;  %s817_s23 = sshll.u32 %s1171_s9, 4  ;;  %s818_s23 = int_to_ptr.vmem [resolvable:$true] %s817_s23 }
 0x38c   :  { %s1074_s3 = scalar_lea.vmem %s818_s23, 32  ;;  %p1079_p1 = scmp.lt.s32.totalorder %s818_s23, %s818_s23 }
 0x38d   :  { %p1075_p0 = scmp.ne.s32.totalorder %s818_s23, %s1074_s3  ;;  %p1080_p2 = scmp.lt.s32.totalorder %s1074_s3, %s1074_s3 }
 0x38e   :  { %1045 = vmatpush3.bf16.msra.mxu0 %v1301_v15 }
 0x38f   :  { %1014 = vmatprep.subr.bf16.mxu0 %v1168_v1  ;;  %p1081_p3 = por %p1080_p2, %p1079_p1 }
 0x391   :  { %p1082_p4 = pnand %p1081_p3, %p1075_p0 }
 0x45c   :  { %v483_v58 = vpop.f32.mrb[8].mxu0 }
 0x45d   :  { %v484_v59 = vadd.f32 %v874_v57, %v483_v58  ;;  %v982_v60 = vpop.f32.mrb[9].mxu0 }
 0x45e   :  { %v486_v61 = vpop.f32.mrb[10].mxu0 }
 0x45f   :  { %v564_v63 = vmul.f32 %v484_v59, %v484_v59  ;;  %v983_v0 = vpop.f32.mrb[11].mxu0  ;;  %993 = vmatmul.mubr.msk.f32.vlgmr.msra.gmra.mrb[6].mxu1 %vm156_vm3, %v484_v59 }
 0x460   :  { %1010 = vmatprep.mubr.msk.bf16.mxu1 %vm1169_vm0, %v1168_v1  ;;  %1007 = vmatpush3.bf16.msra.mxu1 %v1064_v3 }
 0x461   :  { %1004 = vmatmul.mubr.msk.f32.vlgmr.msra.gmra.mrb[6].mxu0 %vm156_vm3, %v564_v63  ;;  %1008 = vmatprep.subr.bf16.mxu1 %v1168_v1 }
 0x462   :  { %1015 = vmatpush3.bf16.msra.mxu0 %v1062_v62  ;;  %1018 = vmatprep.mubr.msk.bf16.mxu0 %vm1169_vm0, %v1168_v1 }
 0x463   :  { %1016 = vmatprep.subr.bf16.mxu0 %v1168_v1 }
 0x464   :  { %1009 = vmatpush3.bf16.msra.mxu1 %v1065_v4 }
 0x466   :  { %1017 = vmatpush3.bf16.msra.mxu0 %v1063_v2 }
 0x469   :  { %1019 = vmatmul.mubr.msk.bf16.vlgmr.msra.gmra.mrb[12].mxu0 %vm156_vm3, %v1308_v23 }
 0x532   :  { %v560_v5 = vpop.f32.mrb[6].mxu1 }
 0x533   :  { %v638_v6 = vmul.f32 %v560_v5, %v560_v5  ;;  %v994_v7 = vpop.f32.mrb[7].mxu1  ;;  %v640_v18 = vsub.f32 %v484_v59, %v560_v5 }
 0x534   :  { %v634_v8 = vpop.f32.mrb[6].mxu0 }
 0x535   :  { %v639_v9 = vsub.f32 %v634_v8, %v638_v6  ;;  %v1005_v10 = vpop.f32.mrb[7].mxu0 }
 0x537   :  { %v641_v11 = vadd.f32 1e-05, %v639_v9 }
 0x539   :  { %1068 = vrsqrt.f32 %v641_v11 }
 0x53c   :  { %v777_v13 = vpop.f32.mrb[12].mxu0 }
 0x53d   :  { %v778_v14 = vadd.f32 %v885_v12, %v777_v13  ;;  %v1020_v15 = vpop.f32.mrb[13].mxu0 }
 0x53e   :  { %v780_v16 = vpop.f32.mrb[14].mxu0 }
 0x53f   :  { %v1021_v17 = vpop.f32.mrb[15].mxu0  ;;  %v784_v1 = vsel %vm783_vm6, %v778_v14, -inf }
 0x540   :  { %785 = vmax.xlane.f32.xlu0 %v784_v1 }
 0x543   :  { %v1069_v19 = vpop.eup %1068 }
 0x544   :  { %v643_v21 = vmul.f32 %v1069_v19, %v640_v18 }
 0x546   :  { %v648_v23 = vmul.f32 %v879_v20, %v643_v21 }
 0x548   :  { %v653_v24 = vadd.f32 %v880_v22, %v648_v23 }
 0x54a   :  { %v654_v25 = vmax.f32 %v653_v24, 0.0 }
 0x54c   :  { %v655_v26 = vpack.c.bf16 %v654_v25, %v654_v25 }
 0x54e   :  { %1011 = vmatmul.mubr.msk.bf16.vlgmr.msra.gmra.mrb[12].mxu1 %vm156_vm3, %v655_v26 }
 0x5cd   :  { %v786_v27 = vpop.xlane.xlu0 %785 }
 0x5ce   :  { %v787_v28 = vsub.f32 %v778_v14, %v786_v27 }
 0x5d0   :  { %v788_v29 = vmul.f32 1.442695, %v787_v28 }
 0x5d2   :  { %1070 = vpow2.f32 %v788_v29 }
 0x5dc   :  { %v1398_v30 = vpop.eup %1070 }
 0x5dd   :  { %v790_v31 = vsel %vm783_vm6, %v1398_v30, 0.0 }
 0x5de   :  { %791 = vadd.xlane.f32.xlu0 %v790_v31 }
 0x5df   :  { %1085 = shalt.err (!%p1082_p4)
}
 0x5e0   :  { %s1086_s25 = scalar_lea.hbm %s1468_s12, 32 }
 0x5e1   :  { %p1087_p5 = scmp.ne.s32.totalorder %s1468_s12, %s1086_s25  ;;  %p1090_p6 = scmp.lt.u32.totalorder %s1086_s25, %s1468_s12 }
 0x5e3   :  { %p1092_p7 = pnand %p1090_p6, %p1087_p5 }
 0x5e5   :  { %1095 = shalt.err (!%p1092_p7)
}
 0x5e6   :  { %820 = dma.vmem_to_hbm [thread:$0]  %s818_s23, 32, %s1468_s12, [#allocation5]  }
 0x5e7   :  { %s1096_s2 = scalar_lea.vmem %s808_s7, 32  ;;  %p1101_p9 = scmp.lt.s32.totalorder %s808_s7, %s808_s7 }
 0x5e8   :  { %p1097_p8 = scmp.ne.s32.totalorder %s808_s7, %s1096_s2  ;;  %p1102_p10 = scmp.lt.s32.totalorder %s1096_s2, %s1096_s2 }
 0x5ea   :  { %p1103_p11 = por %p1102_p10, %p1101_p9 }
 0x5ec   :  { %p1104_p12 = pnand %p1103_p11, %p1097_p8 }
 0x5ee   :  { %1107 = shalt.err (!%p1104_p12)
}
 0x5ef   :  { %s1108_s17 = scalar_lea.hbm %s1467_s11, 32 }
 0x5f0   :  { %p1109_p13 = scmp.ne.s32.totalorder %s1467_s11, %s1108_s17  ;;  %p1112_p0 = scmp.lt.u32.totalorder %s1108_s17, %s1467_s11 }
 0x5f2   :  { %p1114_p1 = pnand %p1112_p0, %p1109_p13 }
 0x5f4   :  { %1117 = shalt.err (!%p1114_p1)
}
 0x5f5   :  { %810 = dma.vmem_to_hbm [thread:$0]  %s808_s7, 32, %s1467_s11, [#allocation3]   ;;  %v881_v32 = vld [vmem:[%s1464_s8 + $0x1] ss:$0 sm:$0xff] }
 0x5f6   :  { %s1173_s22 = smov [#allocation6]  }
 0x5f7   :  { %s827_s9 = sshll.u32 %s1173_s22, 4  ;;  %s828_s9 = int_to_ptr.vmem [resolvable:$true] %s827_s9 }
 0x5f8   :  { %s1118_s23 = scalar_lea.vmem %s828_s9, 32  ;;  %p1123_p3 = scmp.lt.s32.totalorder %s828_s9, %s828_s9 }
 0x5f9   :  { %p1119_p2 = scmp.ne.s32.totalorder %s828_s9, %s1118_s23  ;;  %p1124_p4 = scmp.lt.s32.totalorder %s1118_s23, %s1118_s23 }
 0x5fb   :  { %p1125_p5 = por %p1124_p4, %p1123_p3 }
 0x5fd   :  { %p1126_p6 = pnand %p1125_p5, %p1119_p2 }
 0x621   :  { %v714_v33 = vpop.f32.mrb[12].mxu1 }
 0x622   :  { %v715_v34 = vadd.f32 %v881_v32, %v714_v33  ;;  %v1012_v35 = vpop.f32.mrb[13].mxu1 }
 0x623   :  { %v717_v36 = vpop.f32.mrb[14].mxu1 }
 0x624   :  { %v1013_v37 = vpop.f32.mrb[15].mxu1  ;;  %799 = vst.msk [vmem:[#allocation6] sm:$0x3] %vm797_vm4, %v715_v34 }
 0x625   :  { %1129 = shalt.err (!%p1126_p6)
}
 0x626   :  { %s1130_s8 = scalar_lea.hbm %s1469_s13, 32 }
 0x627   :  { %p1131_p7 = scmp.ne.s32.totalorder %s1469_s13, %s1130_s8  ;;  %p1134_p8 = scmp.lt.u32.totalorder %s1130_s8, %s1469_s13 }
 0x629   :  { %p1136_p9 = pnand %p1134_p8, %p1131_p7 }
 0x62b   :  { %1139 = shalt.err (!%p1136_p9)
}
 0x62c   :  { %830 = dma.vmem_to_hbm [thread:$0]  %s828_s9, 32, %s1469_s13, [#allocation5]  }
 0x62d   :  { %s1174_s27 = smov [#allocation7]  }
 0x62e   :  { %s837_s4 = sshll.u32 %s1174_s27, 4  ;;  %s838_s4 = int_to_ptr.vmem [resolvable:$true] %s837_s4 }
 0x62f   :  { %s1140_s28 = scalar_lea.vmem %s838_s4, 32  ;;  %p1145_p11 = scmp.lt.s32.totalorder %s838_s4, %s838_s4 }
 0x630   :  { %p1141_p10 = scmp.ne.s32.totalorder %s838_s4, %s1140_s28  ;;  %p1146_p12 = scmp.lt.s32.totalorder %s1140_s28, %s1140_s28 }
 0x632   :  { %p1147_p13 = por %p1146_p12, %p1145_p11 }
 0x634   :  { %p1148_p0 = pnand %p1147_p13, %p1141_p10 }
 0x66b   :  { %v792_v38 = vpop.xlane.xlu0 %791 }
 0x66c   :  { %1072 = vrcp.f32 %v792_v38 }
 0x676   :  { %v1073_v39 = vpop.eup %1072 }
 0x677   :  { %v794_v40 = vmul.f32 %v1073_v39, %v1398_v30 }
 0x679   :  { %800 = vst.msk [vmem:[#allocation7] sm:$0x3] %vm783_vm6, %v794_v40 }
 0x67a   :  { %1151 = shalt.err (!%p1148_p0)
}
 0x67b   :  { %s1152_s13 = scalar_lea.hbm %s1470_s14, 32 }
 0x67c   :  { %p1153_p1 = scmp.ne.s32.totalorder %s1470_s14, %s1152_s13  ;;  %p1156_p2 = scmp.lt.u32.totalorder %s1152_s13, %s1470_s14 }
 0x67e   :  { %p1158_p3 = pnand %p1156_p2, %p1153_p1 }
 0x680   :  { %1161 = shalt.err (!%p1158_p3)
}
 0x681   :  { %840 = dma.vmem_to_hbm [thread:$0]  %s838_s4, 32, %s1470_s14, [#allocation8]  }
 0x682   :  { %1162 = dma.done.wait [#allocation3], 32  }
 0x683   :  { %1163 = vsyncadd [#allocation3], 4294967264 }
 0x684   :  { %1164 = dma.done.wait [#allocation5], 64  }
 0x685   :  { %1165 = vsyncadd [#allocation5], 4294967232 }
 0x686   :  { %1166 = dma.done.wait [#allocation8], 32  }
 0x687   :  { %1167 = vsyncadd [#allocation8], 4294967264 }
 0x688   :  { %853 = vsyncpa [#allocation3], 1 }
 0x689   :  { %854 = vsyncpa [#allocation5], 1 }
 0x68a   :  { %855 = vsyncpa [#allocation8], 1 }

// kernel: yshape_forward.2
= control target key start
LH: loop header
LB: loop body
LE: loop exit
PB: predicated region body
PF: predicated region fallthrough
CT: control target
= control target key end

     0   :  { %s2909_s27 = smov 0   ;;  %s3355_s0 = inlined_call_operand.vmem [shape: bf16[128,9], index: 0, kind: input, shape index: {}]   ;;  %s3356_s1 = inlined_call_operand.vmem [shape: bf16[9,32], index: 1, kind: input, shape index: {}]   ;;  %s3357_s2 = inlined_call_operand.vmem [shape: f32[32,32], index: 2, kind: input, shape index: {}]   ;;  %s3358_s3 = inlined_call_operand.vmem [shape: f32[3,32], index: 3, kind: input, shape index: {}]   ;;  %s3359_s4 = inlined_call_operand.vmem [shape: bf16[9,16,64], index: 4, kind: input, shape index: {}]   ;;  %s3360_s5 = inlined_call_operand.vmem [shape: bf16[9,32,64], index: 5, kind: input, shape index: {}]   ;;  %s3361_s6 = inlined_call_operand.vmem [shape: f32[64,64], index: 6, kind: input, shape index: {}]   ;;  %s3362_s7 = inlined_call_operand.vmem [shape: f32[5,64], index: 7, kind: input, shape index: {}]   ;;  %s3363_s8 = inlined_call_operand.vmem [shape: f32[2,1,64], index: 8, kind: output, shape index: {}]  }
   0x1 LB: > { %s2915_s28 = sadd.s32 4294967295, %s2858_s27   ;;  %p2210_p0 = scmp.ge.s32.totalorder %s2858_s27, 1  ;;  %s2858_s27 = sphi %s2909_s27, %s18_s27  }
   0x2   : > { %p263_p1 = scmp.lt.s32.totalorder %s2858_s27, 3 }
   0x4   : > { %p264_p2 = pnand %p2210_p0, %p263_p1 }
   0x5   : > { %v2814_v0 = vld [vmem:[%s3356_s1] sm:$0x1f] (!%p264_p2)   ;;  %vm358_vm0 = vcmask (!%p264_p2), 1043456   ;;  %vm359_vm1 = vcmask (!%p264_p2), 1044480   ;;  %s2211_s9 = sshll.u32 (!%p264_p2), %s2915_s28, 3  ;;  %v2860_v1 = vmov (!%p264_p2), 65535  }
   0x6   : > { %267 = sbr.rel (%p264_p2) target bundleno = 2892 (0xb4c), region = 52  ;;  %v360_v2 = vsel (!%p264_p2), %vm358_vm0, 4294967295, %v2860_v1  ;;  %p296_p3 = scmp.lt.s32.totalorder (!%p264_p2), %s2211_s9, 15  ;;  %vm345_vm2 = vcmask (!%p264_p2), 72704   ;;  %v430_v9 = vld [vmem:[%s3357_s2] sm:$0xff] (!%p264_p2)  ;;  %v431_v10 = vld [vmem:[%s3357_s2 + $0x8] sm:$0xff] (!%p264_p2) }
   0x7   : > { %v361_v3 = vsel (!%p264_p2), %vm359_vm1, %v360_v2, 0  ;;  %v2932_v11 = vpack.c.bf16 (!%p264_p2), %v431_v10, %v430_v9  ;;  %v2861_v12 = vmov (!%p264_p2), 0.0|0.0   ;;  %v432_v13 = vld [vmem:[%s3357_s2 + $0x10] sm:$0xff] (!%p264_p2)  ;;  %v433_v14 = vld [vmem:[%s3357_s2 + $0x18] sm:$0xff] (!%p264_p2)  ;;  %vm2862_vm3 = vmmov (!%p264_p2), 0   ;;  %p301_p4 = scmp.lt.s32.totalorder (!%p264_p2), %s2915_s28, 1 }
   0x8   : > { %v363_v4 = vand.u32 (!%p264_p2), %v2814_v0, %v361_v3  ;;  %2742 = vmatprep.subr.bf16.mxu1 (!%p264_p2), %v2861_v12  ;;  %v2943_v15 = vpack.c.bf16 (!%p264_p2), %v433_v14, %v432_v13  ;;  %v2863_v16 = vmov (!%p264_p2), 0.0   ;;  %v2213_v17 = vld [vmem:[%s3358_s3] ss:$0 sm:$0xff] (!%p264_p2)  ;;  %vm436_vm4 = vcmask (!%p264_p2), 261120  }
   0x9   : > { %2744 = vmatpush3.bf16.msra.mxu1 (!%p264_p2), %v2932_v11  ;;  %2472 = vmatprep.mubr.msk.f32.mxu1 (!%p264_p2), %vm2862_vm3, %v2863_v16  ;;  %vm704_vm5 = vcmask (!%p264_p2), 523264   ;;  %vm2157_vm6 = vcmask (!%p264_p2), 516096  }
   0xa   : > { %2454 = vmatprep.subr.bf16.mxu0 (!%p264_p2), %v363_v4  ;;  %2745 = vmatprep.subr.bf16.mxu1 (!%p264_p2), %v2861_v12 }
   0xb   : > { %2455 = vmatpush3.bf16.msra.mxu0 (!%p264_p2), %v363_v4 }
   0xc   : > { %2486 = vmatprep.subr.bf16.mxu0 (!%p264_p2), %v2863_v16 }
   0xd   : > { %s3365_s9 = smov (!%p296_p3, %s2211_s9), 15  ;;  %2747 = vmatpush3.bf16.msra.mxu1 %v2943_v15  ;;  %s3367_s28 = smov (!%p301_p4, %s2915_s28), 1 }
   0xe   : > { %s2212_s10 = sshll.u32 %s3365_s9, 2  ;;  %2748 = vmatprep.subr.bf16.mxu1 %v2861_v12 }
   0xf   : > { %s299_s13 = scalar_lea.vmem %s3355_s0, %s2212_s10  ;;  %s303_s10 = scalar_lea.vmem %s3363_s8, %s3367_s28 }
  0x10   : > { %v2815_v5 = vld [vmem:[%s299_s13] sm:$0xff]   ;;  %v2816_v6 = vld [vmem:[%s299_s13 + $0x8] sm:$0xff]   ;;  %v2817_v7 = vld [vmem:[%s299_s13 + $0x10] sm:$0xff]  }
  0x11   : > { %2456 = vmatprep.mubr.msk.bf16.mxu0 %vm345_vm2, %v2815_v5  ;;  %v2818_v8 = vld [vmem:[%s299_s13 + $0x18] sm:$0xff]  }
  0x12   : > { %2457 = vmatmul.mubr.msk.bf16.vlgmr.msra.gmra.mrb[0].mxu0 %vm345_vm2, %v2816_v6 }
  0x13   : > { %2460 = vmatprep.mubr.msk.bf16.mxu0 %vm345_vm2, %v2817_v7 }
  0x1a   : > { %2461 = vmatmul.mubr.msk.bf16.gmra.mrb[4].mxu0 %vm345_vm2, %v2818_v8 }
  0x1b   : > { %2494 = vmatprep.mubr.msk.bf16.mxu0 %vm2862_vm3, %v2863_v16 }
  0xe5   : > { %v2458_v18 = vpop.f32.mrb[0].mxu0 }
  0xe6   : > { %v399_v19 = vpop.f32.mrb[1].mxu0  ;;  %v2955_v20 = vadd.f32 %v2458_v18, %v2213_v17 }
  0xe7   : > { %v2957_v21 = vadd.f32 %v2213_v17, %v399_v19  ;;  %v2459_v22 = vpop.f32.mrb[2].mxu0 }
  0xe8   : > { %v402_v23 = vpop.f32.mrb[3].mxu0  ;;  %v2961_v25 = vadd.f32 %v2459_v22, %v2213_v17  ;;  %v533_v27 = vmul.f32 %v2955_v20, %v2955_v20  ;;  %v440_v32 = vsel %vm436_vm4, %v2955_v20, 0.0 }
  0xe9   : > { %v531_v24 = vmul.f32 %v2957_v21, %v2957_v21  ;;  %v2963_v26 = vadd.f32 %v2213_v17, %v402_v23  ;;  %v437_v28 = vsel %vm436_vm4, %v2957_v21, 0.0 }
  0xea   : > { %v534_v34 = vmul.f32 %v2961_v25, %v2961_v25  ;;  %v542_v40 = vsel %vm436_vm4, %v533_v27, 0.0  ;;  %v442_v41 = vsel %vm436_vm4, %v2961_v25, 0.0 }
  0xeb   : > { %v438_v29 = vsel %vm436_vm4, %v2963_v26, 0.0  ;;  %v532_v30 = vmul.f32 %v2963_v26, %v2963_v26  ;;  %v539_v33 = vsel %vm436_vm4, %v531_v24, 0.0 }
  0xec   : > { %v439_v31 = vadd.f32 %v438_v29, %v437_v28  ;;  %v544_v48 = vsel %vm436_vm4, %v534_v34, 0.0 }
  0xed   : > { %v540_v35 = vsel %vm436_vm4, %v532_v30, 0.0  ;;  %v2462_v36 = vpop.f32.mrb[4].mxu0 }
  0xee   : > { %v441_v37 = vadd.f32 %v440_v32, %v439_v31  ;;  %v541_v38 = vadd.f32 %v540_v35, %v539_v33  ;;  %v415_v39 = vpop.f32.mrb[5].mxu0  ;;  %v2984_v45 = vadd.f32 %v2462_v36, %v2213_v17 }
  0xef   : > { %v2982_v42 = vadd.f32 %v2213_v17, %v415_v39  ;;  %v2463_v43 = vpop.f32.mrb[6].mxu0 }
  0xf0   : > { %v543_v44 = vadd.f32 %v542_v40, %v541_v38  ;;  %v443_v46 = vadd.f32 %v442_v41, %v441_v37  ;;  %v418_v47 = vpop.f32.mrb[7].mxu0  ;;  %v2993_v54 = vadd.f32 %v2463_v43, %v2213_v17  ;;  %v537_v57 = vmul.f32 %v2984_v45, %v2984_v45 }
  0xf1   : > { %v444_v49 = vsel %vm436_vm4, %v2982_v42, 0.0  ;;  %v535_v50 = vmul.f32 %v2982_v42, %v2982_v42  ;;  %v2991_v51 = vadd.f32 %v2213_v17, %v418_v47  ;;  %v448_v61 = vsel %vm436_vm4, %v2984_v45, 0.0 }
  0xf2   : > { %v445_v52 = vadd.f32 %v444_v49, %v443_v46  ;;  %v545_v53 = vadd.f32 %v544_v48, %v543_v44  ;;  %v538_v62 = vmul.f32 %v2993_v54, %v2993_v54  ;;  %v450_v1 = vsel %vm436_vm4, %v2993_v54, 0.0 }
  0xf3   : > { %v546_v55 = vsel %vm436_vm4, %v535_v50, 0.0  ;;  %v446_v56 = vsel %vm436_vm4, %v2991_v51, 0.0  ;;  %v536_v60 = vmul.f32 %v2991_v51, %v2991_v51  ;;  %v550_v3 = vsel %vm436_vm4, %v537_v57, 0.0 }
  0xf4   : > { %v547_v58 = vadd.f32 %v546_v55, %v545_v53  ;;  %v447_v59 = vadd.f32 %v446_v56, %v445_v52  ;;  %v552_v6 = vsel %vm436_vm4, %v538_v62, 0.0 }
  0xf5   : > { %v548_v0 = vsel %vm436_vm4, %v536_v60, 0.0 }
  0xf6   : > { %v449_v63 = vadd.f32 %v448_v61, %v447_v59  ;;  %v549_v2 = vadd.f32 %v548_v0, %v547_v58 }
  0xf8   : > { %v451_v4 = vadd.f32 %v450_v1, %v449_v63  ;;  %v551_v5 = vadd.f32 %v550_v3, %v549_v2 }
  0xfa   : > { %v452_v7 = vrot.slane %v451_v4, 4  ;;  %v553_v8 = vadd.f32 %v552_v6, %v551_v5 }
  0xfc   : > { %v453_v9 = vadd.f32 %v452_v7, %v451_v4  ;;  %v554_v10 = vrot.slane %v553_v8, 4 }
  0xfe   : > { %v454_v13 = vrot.slane %v453_v9, 2  ;;  %v555_v14 = vadd.f32 %v554_v10, %v553_v8 }
 0x100   : > { %v455_v17 = vadd.f32 %v454_v13, %v453_v9  ;;  %v556_v18 = vrot.slane %v555_v14, 2 }
 0x102   : > { %v456_v19 = vrot.slane %v455_v17, 1  ;;  %v557_v23 = vadd.f32 %v556_v18, %v555_v14 }
 0x104   : > { %v457_v22 = vadd.f32 %v456_v19, %v455_v17  ;;  %v558_v24 = vrot.slane %v557_v23, 1 }
 0x106   : > { %2473 = vmatmul.mubr.msk.f32.vlgmr.msra.gmra.mrb[0].mxu1 %vm436_vm4, %v457_v22  ;;  %v559_v27 = vadd.f32 %v558_v24, %v557_v23  ;;  %v2819_v23 = vld [vmem:[%s3359_s4 + $0x8] sm:$0xff]   ;;  %v2820_v24 = vld [vmem:[%s3359_s4] sm:$0xff]  }
 0x107   : > { %2750 = vmatpush3.bf16.msra.mxu1 %v2932_v11  ;;  %2483 = vmatprep.mubr.msk.f32.mxu1 %vm2862_vm3, %v2863_v16  ;;  %v635_v11 = vlaneseq }
 0x108   : > { %2751 = vmatprep.subr.bf16.mxu1 %v2861_v12 }
 0x109   : > { %v636_v34 = vshrl.u32 %v635_v11, 7 }
 0x10b   : > { %2753 = vmatpush3.bf16.msra.mxu1 %v2943_v15  ;;  %v3021_v36 = vsub.s32 0, %v636_v34  ;;  %v2824_v34 = vld [vmem:[%s3360_s5] sm:$0xff]  }
 0x10c   : > { %2498 = vmatprep.subr.bf16.mxu1 %v2863_v16 }
 0x10e   : > { %2484 = vmatmul.mubr.msk.f32.vlgmr.msra.gmra.mrb[2].mxu1 %vm436_vm4, %v559_v27  ;;  %v2822_v27 = vld [vmem:[%s3360_s5 + $0x10] sm:$0xff]  }
 0x10f   : > { %2506 = vmatprep.mubr.msk.bf16.mxu1 %vm2862_vm3, %v2863_v16 }
 0x1d9   : > { %v527_v28 = vpop.f32.mrb[0].mxu1 }
 0x1da   : > { %v2474_v29 = vpop.f32.mrb[1].mxu1  ;;  %v633_v30 = vmul.f32 %v527_v28, %v527_v28  ;;  %v638_v15 = vrot.slane %v527_v28, %v3021_v36  ;;  %v2821_v28 = vld [vmem:[%s3359_s4 + $0x10] sm:$0xff]  }
 0x1db   : > { %v2823_v29 = vld [vmem:[%s3360_s5 + $0x18] sm:$0xff]  }
 0x1dc   : > { %v639_v38 = vsub.f32 %v2957_v21, %v638_v15  ;;  %v640_v39 = vsub.f32 %v2963_v26, %v638_v15  ;;  %v641_v40 = vsub.f32 %v2955_v20, %v638_v15  ;;  %v642_v41 = vsub.f32 %v2961_v25, %v638_v15  ;;  %v2225_v21 = vld [vmem:[%s3358_s3 + $0x1] ss:$0 sm:$0xff] }
 0x1dd   : > { %v643_v44 = vsub.f32 %v2982_v42, %v638_v15  ;;  %v644_v46 = vsub.f32 %v2991_v51, %v638_v15  ;;  %v645_v47 = vsub.f32 %v2984_v45, %v638_v15  ;;  %v646_v48 = vsub.f32 %v2993_v54, %v638_v15  ;;  %v2226_v42 = vld [vmem:[%s3358_s3 + $0x2] ss:$0 sm:$0xff] }
 0x1e1   : > { %v629_v31 = vpop.f32.mrb[2].mxu1 }
 0x1e2   : > { %v634_v32 = vsub.f32 %v629_v31, %v633_v30  ;;  %v2485_v33 = vpop.f32.mrb[3].mxu1 }
 0x1e4   : > { %v647_v35 = vadd.f32 1e-05, %v634_v32 }
 0x1e6   : > { %2846 = vrsqrt.f32 %v647_v35 }
 0x1f0   : > { %v2847_v37 = vpop.eup %2846 }
 0x1f1   : > { %v652_v43 = vrot.slane %v2847_v37, %v3021_v36 }
 0x1f3   : > { %v653_v49 = vmul.f32 %v652_v43, %v639_v38  ;;  %v654_v26 = vmul.f32 %v652_v43, %v640_v39  ;;  %v655_v50 = vmul.f32 %v652_v43, %v641_v40  ;;  %v656_v20 = vmul.f32 %v652_v43, %v642_v41  ;;  %v2825_v40 = vld [vmem:[%s3360_s5 + $0x8] sm:$0xff]   ;;  %v2826_v41 = vld [vmem:[%s3360_s5 + $0x20] sm:$0xff]  }
 0x1f4   : > { %v657_v52 = vmul.f32 %v652_v43, %v643_v44  ;;  %v658_v25 = vmul.f32 %v652_v43, %v644_v46  ;;  %v659_v53 = vmul.f32 %v652_v43, %v645_v47  ;;  %v660_v55 = vmul.f32 %v652_v43, %v646_v48  ;;  %v2827_v43 = vld [vmem:[%s3360_s5 + $0x28] sm:$0xff]  }
 0x1f5   : > { %v665_v51 = vmul.f32 %v2225_v21, %v653_v49  ;;  %v666_v45 = vmul.f32 %v2225_v21, %v654_v26  ;;  %v667_v56 = vmul.f32 %v2225_v21, %v655_v50  ;;  %v668_v54 = vmul.f32 %v2225_v21, %v656_v20  ;;  %v2828_v49 = vld [vmem:[%s3359_s4 + $0x18] sm:$0xff]   ;;  %v2829_v26 = vld [vmem:[%s3360_s5 + $0x30] sm:$0xff]  }
 0x1f6   : > { %v669_v57 = vmul.f32 %v2225_v21, %v657_v52  ;;  %v670_v58 = vmul.f32 %v2225_v21, %v658_v25  ;;  %v671_v59 = vmul.f32 %v2225_v21, %v659_v53  ;;  %v672_v60 = vmul.f32 %v2225_v21, %v660_v55  ;;  %v2830_v50 = vld [vmem:[%s3360_s5 + $0x38] sm:$0xff]  }
 0x1f7   : > { %v677_v61 = vadd.f32 %v2226_v42, %v665_v51  ;;  %v678_v62 = vadd.f32 %v2226_v42, %v666_v45  ;;  %v679_v63 = vadd.f32 %v2226_v42, %v667_v56  ;;  %v680_v0 = vadd.f32 %v2226_v42, %v668_v54 }
 0x1f8   : > { %v681_v1 = vadd.f32 %v2226_v42, %v669_v57  ;;  %v682_v2 = vadd.f32 %v2226_v42, %v670_v58  ;;  %v683_v3 = vadd.f32 %v2226_v42, %v671_v59  ;;  %v684_v4 = vadd.f32 %v2226_v42, %v672_v60 }
 0x1f9   : > { %v685_v5 = vmax.f32 %v677_v61, 0.0  ;;  %v686_v6 = vmax.f32 %v678_v62, 0.0  ;;  %v687_v7 = vmax.f32 %v679_v63, 0.0  ;;  %v688_v8 = vmax.f32 %v680_v0, 0.0 }
 0x1fa   : > { %v689_v9 = vmax.f32 %v681_v1, 0.0  ;;  %v690_v10 = vmax.f32 %v682_v2, 0.0  ;;  %v691_v13 = vmax.f32 %v683_v3, 0.0  ;;  %v692_v14 = vmax.f32 %v684_v4, 0.0  ;;  %v2831_v4 = vld [vmem:[%s3359_s4 + $0x20] sm:$0xff]  }
 0x1fb   : > { %v3039_v17 = vpack.c.bf16 %v686_v6, %v685_v5  ;;  %v3041_v18 = vpack.c.bf16 %v688_v8, %v687_v7  ;;  %v2832_v5 = vld [vmem:[%s3360_s5 + $0x40] sm:$0xff]   ;;  %v2833_v6 = vld [vmem:[%s3360_s5 + $0x48] sm:$0xff]  }
 0x1fc   : > { %v3043_v19 = vpack.c.bf16 %v690_v10, %v689_v9  ;;  %v3045_v22 = vpack.c.bf16 %v692_v14, %v691_v13 }
 0x1fd   : > { %2487 = vmatpush3.bf16.msra.mxu0 %v3039_v17  ;;  %2499 = vmatpush3.bf16.msra.mxu1 %v3039_v17 }
 0x1fe   : > { %2488 = vmatprep.subr.bf16.mxu0 %v2863_v16  ;;  %2500 = vmatprep.subr.bf16.mxu1 %v2863_v16 }
 0x201   : > { %2489 = vmatpush3.bf16.msra.mxu0 %v3041_v18  ;;  %2501 = vmatpush3.bf16.msra.mxu1 %v3041_v18 }
 0x202   : > { %2490 = vmatprep.subr.bf16.mxu0 %v2863_v16  ;;  %2502 = vmatprep.subr.bf16.mxu1 %v2863_v16 }
 0x205   : > { %2491 = vmatpush3.bf16.msra.mxu0 %v3043_v19  ;;  %2503 = vmatpush3.bf16.msra.mxu1 %v3043_v19 }
 0x206   : > { %2492 = vmatprep.subr.bf16.mxu0 %v2863_v16  ;;  %2504 = vmatprep.subr.bf16.mxu1 %v2863_v16 }
 0x209   : > { %2493 = vmatpush3.bf16.msra.mxu0 %v3045_v22  ;;  %2505 = vmatpush3.bf16.msra.mxu1 %v3045_v22 }
 0x20a   : > { %2526 = vmatprep.subr.bf16.mxu1 %v2863_v16  ;;  %2510 = vmatprep.subr.bf16.mxu0 %v2863_v16 }
 0x20c   : > { %2507 = vmatmul.mubr.msk.bf16.vlgmr.msra.gmra.mrb[4].mxu1 %vm704_vm5, %v2819_v23  ;;  %2495 = vmatmul.mubr.msk.bf16.vlgmr.msra.gmra.mrb[8].mxu0 %vm704_vm5, %v2820_v24 }
 0x20d   : > { %2527 = vmatpush3.bf16.msra.mxu1 %v3039_v17  ;;  %2534 = vmatprep.mubr.msk.bf16.mxu1 %vm2862_vm3, %v2863_v16 }
 0x20e   : > { %2528 = vmatprep.subr.bf16.mxu1 %v2863_v16  ;;  %2511 = vmatpush3.bf16.msra.mxu0 %v2822_v27 }
 0x20f   : > { %2512 = vmatprep.subr.bf16.mxu0 %v2863_v16  ;;  %2514 = vmatprep.mubr.msk.bf16.mxu0 %vm2862_vm3, %v2863_v16 }
 0x211   : > { %2529 = vmatpush3.bf16.msra.mxu1 %v3041_v18 }
 0x212   : > { %2530 = vmatprep.subr.bf16.mxu1 %v2863_v16  ;;  %2513 = vmatpush3.bf16.msra.mxu0 %v2823_v29 }
 0x213   : > { %2518 = vmatprep.subr.bf16.mxu0 %v2863_v16 }
 0x215   : > { %2531 = vmatpush3.bf16.msra.mxu1 %v3043_v19 }
 0x216   : > { %2532 = vmatprep.subr.bf16.mxu1 %v2863_v16 }
 0x219   : > { %2533 = vmatpush3.bf16.msra.mxu1 %v3045_v22 }
 0x21a   : > { %2558 = vmatprep.subr.bf16.mxu1 %v2863_v16 }
 0x21c   : > { %2535 = vmatmul.mubr.msk.bf16.vlgmr.msra.gmra.mrb[8].mxu1 %vm704_vm5, %v2821_v28 }
 0x21d   : > { %2562 = vmatprep.mubr.msk.bf16.mxu1 %vm2862_vm3, %v2863_v16  ;;  %2559 = vmatpush3.bf16.msra.mxu1 %v2829_v26 }
 0x21e   : > { %2560 = vmatprep.subr.bf16.mxu1 %v2863_v16 }
 0x221   : > { %2561 = vmatpush3.bf16.msra.mxu1 %v2830_v50 }
 0x222   : > { %2566 = vmatprep.subr.bf16.mxu1 %v2863_v16 }
 0x2df   : > { %v799_v30 = vpop.f32.mrb[4].mxu1  ;;  %v742_v11 = vpop.f32.mrb[8].mxu0 }
 0x2e0   : > { %v2508_v31 = vpop.f32.mrb[5].mxu1  ;;  %v2496_v32 = vpop.f32.mrb[9].mxu0 }
 0x2e1   : > { %v802_v33 = vpop.f32.mrb[6].mxu1  ;;  %v745_v35 = vpop.f32.mrb[10].mxu0  ;;  %v2836_v31 = vld [vmem:[%s3360_s5 + $0x58] sm:$0xff]  }
 0x2e2   : > { %v806_v15 = vpack.c.bf16 %v802_v33, %v799_v30  ;;  %v2509_v37 = vpop.f32.mrb[7].mxu1  ;;  %v749_v38 = vpack.c.bf16 %v745_v35, %v742_v11  ;;  %v2497_v39 = vpop.f32.mrb[11].mxu0  ;;  %v2834_v30 = vld [vmem:[%s3359_s4 + $0x28] sm:$0xff]   ;;  %v2835_v11 = vld [vmem:[%s3360_s5 + $0x50] sm:$0xff]  }
 0x2e4   : > { %2515 = vmatmul.mubr.msk.bf16.vlgmr.msra.gmra.mrb[12].mxu0 %vm436_vm4, %v806_v15 }
 0x2e5   : > { %2519 = vmatpush3.bf16.msra.mxu0 %v2824_v34  ;;  %2522 = vmatprep.mubr.msk.bf16.mxu0 %vm2862_vm3, %v2863_v16 }
 0x2e6   : > { %2520 = vmatprep.subr.bf16.mxu0 %v2863_v16 }
 0x2e9   : > { %2521 = vmatpush3.bf16.msra.mxu0 %v2825_v40 }
 0x2ea   : > { %2538 = vmatprep.subr.bf16.mxu0 %v2863_v16 }
 0x2ec   : > { %2523 = vmatmul.mubr.msk.bf16.vlgmr.msra.gmra.mrb[16].mxu0 %vm436_vm4, %v749_v38 }
 0x2ed   : > { %2539 = vmatpush3.bf16.msra.mxu0 %v2826_v41  ;;  %2542 = vmatprep.mubr.msk.bf16.mxu0 %vm2862_vm3, %v2863_v16 }
 0x2ee   : > { %2540 = vmatprep.subr.bf16.mxu0 %v2863_v16 }
 0x2ef   : > { %v969_v44 = vpop.f32.mrb[8].mxu1 }
 0x2f0   : > { %v2536_v46 = vpop.f32.mrb[9].mxu1 }
 0x2f1   : > { %2541 = vmatpush3.bf16.msra.mxu0 %v2827_v43  ;;  %v972_v47 = vpop.f32.mrb[10].mxu1  ;;  %v2838_v46 = vld [vmem:[%s3360_s5 + $0x60] sm:$0xff]  }
 0x2f2   : > { %v976_v48 = vpack.c.bf16 %v972_v47, %v969_v44  ;;  %v2537_v21 = vpop.f32.mrb[11].mxu1  ;;  %2546 = vmatprep.subr.bf16.mxu0 %v2863_v16  ;;  %v2837_v44 = vld [vmem:[%s3359_s4 + $0x30] sm:$0xff]   ;;  %v2839_v47 = vld [vmem:[%s3360_s5 + $0x68] sm:$0xff]  }
 0x2f4   : > { %2543 = vmatmul.mubr.msk.bf16.vlgmr.msra.gmra.mrb[20].mxu0 %vm436_vm4, %v976_v48 }
 0x2f5   : > { %2547 = vmatpush3.bf16.msra.mxu0 %v3039_v17  ;;  %2554 = vmatprep.mubr.msk.bf16.mxu0 %vm2862_vm3, %v2863_v16 }
 0x2f6   : > { %2548 = vmatprep.subr.bf16.mxu0 %v2863_v16 }
 0x2f9   : > { %2549 = vmatpush3.bf16.msra.mxu0 %v3041_v18 }
 0x2fa   : > { %2550 = vmatprep.subr.bf16.mxu0 %v2863_v16 }
 0x2fd   : > { %2551 = vmatpush3.bf16.msra.mxu0 %v3043_v19 }
 0x2fe   : > { %2552 = vmatprep.subr.bf16.mxu0 %v2863_v16 }
 0x301   : > { %2553 = vmatpush3.bf16.msra.mxu0 %v3045_v22 }
 0x302   : > { %2578 = vmatprep.subr.bf16.mxu0 %v2863_v16 }
 0x304   : > { %2555 = vmatmul.mubr.msk.bf16.vlgmr.msra.gmra.mrb[24].mxu0 %vm704_vm5, %v2828_v49 }
 0x305   : > { %2582 = vmatprep.mubr.msk.bf16.mxu0 %vm2862_vm3, %v2863_v16  ;;  %2579 = vmatpush3.bf16.msra.mxu0 %v2832_v5 }
 0x306   : > { %2580 = vmatprep.subr.bf16.mxu0 %v2863_v16 }
 0x309   : > { %2581 = vmatpush3.bf16.msra.mxu0 %v2833_v6 }
 0x30a   : > { %2586 = vmatprep.subr.bf16.mxu0 %v2863_v16 }
 0x3b7   : > { %v861_v20 = vpop.f32.mrb[12].mxu0 }
 0x3b8   : > { %v2516_v52 = vpop.f32.mrb[13].mxu0 }
 0x3b9   : > { %v864_v25 = vpop.f32.mrb[14].mxu0 }
 0x3ba   : > { %v2517_v53 = vpop.f32.mrb[15].mxu0 }
 0x3bf   : > { %v917_v55 = vpop.f32.mrb[16].mxu0 }
 0x3c0   : > { %v918_v42 = vadd.f32 %v917_v55, %v861_v20  ;;  %v2524_v51 = vpop.f32.mrb[17].mxu0 }
 0x3c1   : > { %v920_v45 = vpop.f32.mrb[18].mxu0  ;;  %v2840_v51 = vld [vmem:[%s3359_s4 + $0x38] sm:$0xff]  }
 0x3c2   : > { %v921_v56 = vadd.f32 %v920_v45, %v864_v25  ;;  %v2525_v54 = vpop.f32.mrb[19].mxu0  ;;  %v2841_v45 = vld [vmem:[%s3360_s5 + $0x70] sm:$0xff]  }
 0x3c7   : > { %v1031_v57 = vpop.f32.mrb[20].mxu0 }
 0x3c8   : > { %v1038_v58 = vadd.f32 %v1031_v57, %v918_v42  ;;  %v2544_v59 = vpop.f32.mrb[21].mxu0 }
 0x3c9   : > { %v1034_v60 = vpop.f32.mrb[22].mxu0 }
 0x3ca   : > { %v1039_v61 = vadd.f32 %v1034_v60, %v921_v56  ;;  %v2545_v62 = vpop.f32.mrb[23].mxu0  ;;  %v2842_v56 = vld [vmem:[%s3360_s5 + $0x78] sm:$0xff]  }
 0x3d7   : > { %v1085_v63 = vpop.f32.mrb[24].mxu0 }
 0x3d8   : > { %v2556_v0 = vpop.f32.mrb[25].mxu0 }
 0x3d9   : > { %v1088_v1 = vpop.f32.mrb[26].mxu0 }
 0x3da   : > { %v1092_v2 = vpack.c.bf16 %v1088_v1, %v1085_v63  ;;  %v2557_v3 = vpop.f32.mrb[27].mxu0 }
 0x3db   : > { %v2843_v3 = vld [vmem:[%s3359_s4 + $0x40] sm:$0xff]  }
 0x3dc   : > { %2563 = vmatmul.mubr.msk.bf16.vlgmr.msra.gmra.mrb[12].mxu1 %vm436_vm4, %v1092_v2 }
 0x3dd   : > { %2567 = vmatpush3.bf16.msra.mxu1 %v3039_v17  ;;  %2574 = vmatprep.mubr.msk.bf16.mxu1 %vm2862_vm3, %v2863_v16 }
 0x3de   : > { %2568 = vmatprep.subr.bf16.mxu1 %v2863_v16 }
 0x3e1   : > { %2569 = vmatpush3.bf16.msra.mxu1 %v3041_v18 }
 0x3e2   : > { %2570 = vmatprep.subr.bf16.mxu1 %v2863_v16 }
 0x3e5   : > { %2571 = vmatpush3.bf16.msra.mxu1 %v3043_v19 }
 0x3e6   : > { %2572 = vmatprep.subr.bf16.mxu1 %v2863_v16 }
 0x3e9   : > { %2573 = vmatpush3.bf16.msra.mxu1 %v3045_v22 }
 0x3ea   : > { %2598 = vmatprep.subr.bf16.mxu1 %v2863_v16 }
 0x3ec   : > { %2575 = vmatmul.mubr.msk.bf16.vlgmr.msra.gmra.mrb[16].mxu1 %vm704_vm5, %v2831_v4 }
 0x3ed   : > { %2602 = vmatprep.mubr.msk.bf16.mxu1 %vm2862_vm3, %v2863_v16  ;;  %2599 = vmatpush3.bf16.msra.mxu1 %v2835_v11  ;;  %v1747_v11 = vld [vmem:[%s3361_s6 + $0x20] sm:$0xff] }
 0x3ee   : > { %2600 = vmatprep.subr.bf16.mxu1 %v2863_v16 }
 0x3f1   : > { %2601 = vmatpush3.bf16.msra.mxu1 %v2836_v31  ;;  %v1748_v31 = vld [vmem:[%s3361_s6 + $0x28] sm:$0xff] }
 0x3f2   : > { %2606 = vmatprep.subr.bf16.mxu1 %v2863_v16 }
 0x4af   : > { %v1147_v7 = vpop.f32.mrb[12].mxu1 }
 0x4b0   : > { %v1154_v8 = vadd.f32 %v1147_v7, %v1038_v58  ;;  %v2564_v9 = vpop.f32.mrb[13].mxu1 }
 0x4b1   : > { %v1150_v10 = vpop.f32.mrb[14].mxu1 }
 0x4b2   : > { %v1155_v13 = vadd.f32 %v1150_v10, %v1039_v61  ;;  %v2565_v14 = vpop.f32.mrb[15].mxu1 }
 0x4bf   : > { %v1201_v23 = vpop.f32.mrb[16].mxu1 }
 0x4c0   : > { %v2576_v24 = vpop.f32.mrb[17].mxu1 }
 0x4c1   : > { %v1204_v27 = vpop.f32.mrb[18].mxu1  ;;  %v1744_v24 = vld [vmem:[%s3361_s6 + $0x8] sm:$0xff] }
 0x4c2   : > { %v1208_v28 = vpack.c.bf16 %v1204_v27, %v1201_v23  ;;  %v2577_v29 = vpop.f32.mrb[19].mxu1  ;;  %v1743_v23 = vld [vmem:[%s3361_s6] sm:$0xff] }
 0x4c3   : > { %v2755_v27 = vpack.c.bf16 %v1744_v24, %v1743_v23  ;;  %v1746_v29 = vld [vmem:[%s3361_s6 + $0x18] sm:$0xff] }
 0x4c4   : > { %2583 = vmatmul.mubr.msk.bf16.vlgmr.msra.gmra.mrb[28].mxu0 %vm436_vm4, %v1208_v28  ;;  %v1745_v28 = vld [vmem:[%s3361_s6 + $0x10] sm:$0xff] }
 0x4c5   : > { %2587 = vmatpush3.bf16.msra.mxu0 %v3039_v17  ;;  %2594 = vmatprep.mubr.msk.bf16.mxu0 %vm2862_vm3, %v2863_v16 }
 0x4c6   : > { %2588 = vmatprep.subr.bf16.mxu0 %v2863_v16 }
 0x4c9   : > { %2589 = vmatpush3.bf16.msra.mxu0 %v3041_v18 }
 0x4ca   : > { %2590 = vmatprep.subr.bf16.mxu0 %v2863_v16 }
 0x4cd   : > { %2591 = vmatpush3.bf16.msra.mxu0 %v3043_v19 }
 0x4ce   : > { %2592 = vmatprep.subr.bf16.mxu0 %v2863_v16 }
 0x4d1   : > { %2593 = vmatpush3.bf16.msra.mxu0 %v3045_v22 }
 0x4d2   : > { %2618 = vmatprep.subr.bf16.mxu0 %v2863_v16 }
 0x4d4   : > { %2595 = vmatmul.mubr.msk.bf16.vlgmr.msra.gmra.mrb[32].mxu0 %vm704_vm5, %v2834_v30  ;;  %v2758_v30 = vpack.c.bf16 %v1746_v29, %v1745_v28 }
 0x4d5   : > { %2622 = vmatprep.mubr.msk.bf16.mxu0 %vm2862_vm3, %v2863_v16  ;;  %2619 = vmatpush3.bf16.msra.mxu0 %v2838_v46 }
 0x4d6   : > { %2620 = vmatprep.subr.bf16.mxu0 %v2863_v16 }
 0x4d9   : > { %2621 = vmatpush3.bf16.msra.mxu0 %v2839_v47 }
 0x4da   : > { %2626 = vmatprep.subr.bf16.mxu0 %v2863_v16 }
 0x597   : > { %v1263_v32 = vpop.f32.mrb[28].mxu0 }
 0x598   : > { %v1270_v33 = vadd.f32 %v1263_v32, %v1154_v8  ;;  %v2584_v34 = vpop.f32.mrb[29].mxu0  ;;  %v2761_v32 = vpack.c.bf16 %v1748_v31, %v1747_v11 }
 0x599   : > { %v1266_v35 = vpop.f32.mrb[30].mxu0  ;;  %v1750_v34 = vld [vmem:[%s3361_s6 + $0x38] sm:$0xff] }
 0x59a   : > { %v1271_v15 = vadd.f32 %v1266_v35, %v1155_v13  ;;  %v2585_v37 = vpop.f32.mrb[31].mxu0 }
 0x59b   : > { %v2320_v37 = vld [vmem:[%s3362_s7] ss:$0 sm:$0xff] }
 0x5a7   : > { %v1317_v38 = vpop.f32.mrb[32].mxu0 }
 0x5a8   : > { %v2596_v39 = vpop.f32.mrb[33].mxu0 }
 0x5a9   : > { %v1320_v40 = vpop.f32.mrb[34].mxu0 }
 0x5aa   : > { %v1324_v41 = vpack.c.bf16 %v1320_v40, %v1317_v38  ;;  %v2597_v43 = vpop.f32.mrb[35].mxu0 }
 0x5ac   : > { %2603 = vmatmul.mubr.msk.bf16.vlgmr.msra.gmra.mrb[20].mxu1 %vm436_vm4, %v1324_v41 }
 0x5ad   : > { %2607 = vmatpush3.bf16.msra.mxu1 %v3039_v17  ;;  %2614 = vmatprep.mubr.msk.bf16.mxu1 %vm2862_vm3, %v2863_v16 }
 0x5ae   : > { %2608 = vmatprep.subr.bf16.mxu1 %v2863_v16 }
 0x5b1   : > { %2609 = vmatpush3.bf16.msra.mxu1 %v3041_v18 }
 0x5b2   : > { %2610 = vmatprep.subr.bf16.mxu1 %v2863_v16 }
 0x5b5   : > { %2611 = vmatpush3.bf16.msra.mxu1 %v3043_v19 }
 0x5b6   : > { %2612 = vmatprep.subr.bf16.mxu1 %v2863_v16 }
 0x5b9   : > { %2613 = vmatpush3.bf16.msra.mxu1 %v3045_v22 }
 0x5ba   : > { %2638 = vmatprep.subr.bf16.mxu1 %v2863_v16 }
 0x5bc   : > { %2615 = vmatmul.mubr.msk.bf16.vlgmr.msra.gmra.mrb[24].mxu1 %vm704_vm5, %v2837_v44 }
 0x5bd   : > { %2642 = vmatprep.mubr.msk.bf16.mxu1 %vm2862_vm3, %v2863_v16  ;;  %2639 = vmatpush3.bf16.msra.mxu1 %v2841_v45 }
 0x5be   : > { %2640 = vmatprep.subr.bf16.mxu1 %v2863_v16 }
 0x5c1   : > { %2641 = vmatpush3.bf16.msra.mxu1 %v2842_v56 }
 0x5c2   : > { %2646 = vmatprep.subr.bf16.mxu1 %v2863_v16 }
 0x67f   : > { %v1379_v48 = vpop.f32.mrb[20].mxu1 }
 0x680   : > { %v1386_v21 = vadd.f32 %v1379_v48, %v1270_v33  ;;  %v2604_v49 = vpop.f32.mrb[21].mxu1  ;;  %v1749_v33 = vld [vmem:[%s3361_s6 + $0x30] sm:$0xff] }
 0x681   : > { %v1382_v26 = vpop.f32.mrb[22].mxu1  ;;  %v2764_v35 = vpack.c.bf16 %v1750_v34, %v1749_v33 }
 0x682   : > { %v1387_v50 = vadd.f32 %v1382_v26, %v1271_v15  ;;  %v2605_v20 = vpop.f32.mrb[23].mxu1 }
 0x68f   : > { %v1433_v52 = vpop.f32.mrb[24].mxu1 }
 0x690   : > { %v2616_v25 = vpop.f32.mrb[25].mxu1 }
 0x691   : > { %v1436_v53 = vpop.f32.mrb[26].mxu1 }
 0x692   : > { %v1440_v55 = vpack.c.bf16 %v1436_v53, %v1433_v52  ;;  %v2617_v42 = vpop.f32.mrb[27].mxu1 }
 0x694   : > { %2623 = vmatmul.mubr.msk.bf16.vlgmr.msra.gmra.mrb[36].mxu0 %vm436_vm4, %v1440_v55 }
 0x695   : > { %2627 = vmatpush3.bf16.msra.mxu0 %v3039_v17  ;;  %2634 = vmatprep.mubr.msk.bf16.mxu0 %vm2862_vm3, %v2863_v16 }
 0x696   : > { %2628 = vmatprep.subr.bf16.mxu0 %v2863_v16 }
 0x699   : > { %2629 = vmatpush3.bf16.msra.mxu0 %v3041_v18 }
 0x69a   : > { %2630 = vmatprep.subr.bf16.mxu0 %v2863_v16 }
 0x69d   : > { %2631 = vmatpush3.bf16.msra.mxu0 %v3043_v19 }
 0x69e   : > { %2632 = vmatprep.subr.bf16.mxu0 %v2863_v16 }
 0x6a1   : > { %2633 = vmatpush3.bf16.msra.mxu0 %v3045_v22 }
 0x6a2   : > { %2658 = vmatprep.subr.bf16.mxu0 %v2863_v16 }
 0x6a4   : > { %2635 = vmatmul.mubr.msk.bf16.vlgmr.msra.gmra.mrb[40].mxu0 %vm704_vm5, %v2840_v51 }
 0x6a5   : > { %2662 = vmatprep.mubr.msk.bf16.mxu0 %vm2862_vm3, %v2863_v16 }
 0x767   : > { %v1495_v54 = vpop.f32.mrb[36].mxu0 }
 0x768   : > { %v1502_v57 = vadd.f32 %v1495_v54, %v1386_v21  ;;  %v2624_v58 = vpop.f32.mrb[37].mxu0 }
 0x769   : > { %v1498_v59 = vpop.f32.mrb[38].mxu0 }
 0x76a   : > { %v1503_v60 = vadd.f32 %v1498_v59, %v1387_v50  ;;  %v2625_v61 = vpop.f32.mrb[39].mxu0 }
 0x777   : > { %v1549_v62 = vpop.f32.mrb[40].mxu0 }
 0x778   : > { %v2636_v63 = vpop.f32.mrb[41].mxu0 }
 0x779   : > { %v1552_v0 = vpop.f32.mrb[42].mxu0 }
 0x77a   : > { %v1556_v1 = vpack.c.bf16 %v1552_v0, %v1549_v62  ;;  %v2637_v2 = vpop.f32.mrb[43].mxu0 }
 0x77c   : > { %2643 = vmatmul.mubr.msk.bf16.vlgmr.msra.gmra.mrb[28].mxu1 %vm436_vm4, %v1556_v1 }
 0x77d   : > { %2647 = vmatpush3.bf16.msra.mxu1 %v3039_v17  ;;  %2654 = vmatprep.mubr.msk.bf16.mxu1 %vm2862_vm3, %v2863_v16  ;;  %v2844_v17 = vld [vmem:[%s3360_s5 + $0x80] sm:$0xff]  }
 0x77e   : > { %2648 = vmatprep.subr.bf16.mxu1 %v2863_v16  ;;  %2659 = vmatpush3.bf16.msra.mxu0 %v2844_v17 }
 0x77f   : > { %2660 = vmatprep.subr.bf16.mxu0 %v2863_v16 }
 0x781   : > { %2649 = vmatpush3.bf16.msra.mxu1 %v3041_v18  ;;  %v2845_v18 = vld [vmem:[%s3360_s5 + $0x88] sm:$0xff]  }
 0x782   : > { %2650 = vmatprep.subr.bf16.mxu1 %v2863_v16  ;;  %2661 = vmatpush3.bf16.msra.mxu0 %v2845_v18 }
 0x783   : > { %2754 = vmatprep.subr.bf16.mxu0 %v2861_v12 }
 0x785   : > { %2651 = vmatpush3.bf16.msra.mxu1 %v3043_v19 }
 0x786   : > { %2652 = vmatprep.subr.bf16.mxu1 %v2863_v16 }
 0x789   : > { %2653 = vmatpush3.bf16.msra.mxu1 %v3045_v22 }
 0x78a   : > { %2766 = vmatprep.subr.bf16.mxu1 %v2861_v12 }
 0x78c   : > { %2655 = vmatmul.mubr.msk.bf16.vlgmr.msra.gmra.mrb[32].mxu1 %vm704_vm5, %v2843_v3 }
 0x78d   : > { %2701 = vmatprep.mubr.msk.f32.mxu1 %vm2862_vm3, %v2863_v16  ;;  %2768 = vmatpush3.bf16.msra.mxu1 %v2755_v27 }
 0x78e   : > { %2769 = vmatprep.subr.bf16.mxu1 %v2861_v12 }
 0x791   : > { %2771 = vmatpush3.bf16.msra.mxu1 %v2758_v30 }
 0x792   : > { %2772 = vmatprep.subr.bf16.mxu1 %v2861_v12 }
 0x795   : > { %2774 = vmatpush3.bf16.msra.mxu1 %v2761_v32 }
 0x796   : > { %2775 = vmatprep.subr.bf16.mxu1 %v2861_v12 }
 0x799   : > { %2777 = vmatpush3.bf16.msra.mxu1 %v2764_v35 }
 0x79a   : > { %2790 = vmatprep.subr.bf16.mxu1 %v2861_v12 }
 0x84f   : > { %v1611_v19 = vpop.f32.mrb[28].mxu1 }
 0x850   : > { %v1618_v22 = vadd.f32 %v1611_v19, %v1502_v57  ;;  %v2644_v4 = vpop.f32.mrb[29].mxu1 }
 0x851   : > { %v1614_v5 = vpop.f32.mrb[30].mxu1 }
 0x852   : > { %v1619_v6 = vadd.f32 %v1614_v5, %v1503_v60  ;;  %v2645_v7 = vpop.f32.mrb[31].mxu1 }
 0x85f   : > { %v1665_v8 = vpop.f32.mrb[32].mxu1 }
 0x860   : > { %v2656_v9 = vpop.f32.mrb[33].mxu1 }
 0x861   : > { %v1668_v10 = vpop.f32.mrb[34].mxu1 }
 0x862   : > { %v1672_v13 = vpack.c.bf16 %v1668_v10, %v1665_v8  ;;  %v2657_v14 = vpop.f32.mrb[35].mxu1 }
 0x864   : > { %2663 = vmatmul.mubr.msk.bf16.vlgmr.msra.gmra.mrb[44].mxu0 %vm436_vm4, %v1672_v13 }
 0x865   : > { %2682 = vmatprep.mubr.msk.f32.mxu0 %vm2862_vm3, %v2863_v16  ;;  %2756 = vmatpush3.bf16.msra.mxu0 %v2755_v27 }
 0x866   : > { %2757 = vmatprep.subr.bf16.mxu0 %v2861_v12 }
 0x869   : > { %2759 = vmatpush3.bf16.msra.mxu0 %v2758_v30 }
 0x86a   : > { %2760 = vmatprep.subr.bf16.mxu0 %v2861_v12 }
 0x86d   : > { %2762 = vmatpush3.bf16.msra.mxu0 %v2761_v32 }
 0x86e   : > { %2763 = vmatprep.subr.bf16.mxu0 %v2861_v12 }
 0x871   : > { %2765 = vmatpush3.bf16.msra.mxu0 %v2764_v35 }
 0x872   : > { %2778 = vmatprep.subr.bf16.mxu0 %v2861_v12 }
 0x937   : > { %v1727_v15 = vpop.f32.mrb[44].mxu0 }
 0x938   : > { %v1734_v38 = vadd.f32 %v1727_v15, %v1618_v22  ;;  %v2664_v39 = vpop.f32.mrb[45].mxu0 }
 0x939   : > { %v1730_v40 = vpop.f32.mrb[46].mxu0 }
 0x93a   : > { %v1741_v41 = vadd.f32 %v2320_v37, %v1734_v38  ;;  %v1735_v43 = vadd.f32 %v1730_v40, %v1619_v6  ;;  %v2665_v44 = vpop.f32.mrb[47].mxu0  ;;  %v2324_v6 = vld [vmem:[%s3362_s7 + $0x2] ss:$0 sm:$0xff] }
 0x93c   : > { %v1835_v46 = vmul.f32 %v1741_v41, %v1741_v41  ;;  %v1742_v47 = vadd.f32 %v2320_v37, %v1735_v43  ;;  %v1753_v48 = vsel %vm704_vm5, %v1741_v41, 0.0 }
 0x93e   : > { %v1754_v21 = vsel %vm704_vm5, %v1742_v47, 0.0  ;;  %v1836_v49 = vmul.f32 %v1742_v47, %v1742_v47  ;;  %v1837_v50 = vsel %vm704_vm5, %v1835_v46, 0.0 }
 0x93f   : > { %v1755_v26 = vadd.f32 %v1754_v21, %v1753_v48 }
 0x940   : > { %v1838_v20 = vsel %vm704_vm5, %v1836_v49, 0.0 }
 0x941   : > { %v1756_v52 = vrot.slane %v1755_v26, 4  ;;  %v1839_v25 = vadd.f32 %v1838_v20, %v1837_v50 }
 0x943   : > { %v1757_v53 = vadd.f32 %v1756_v52, %v1755_v26  ;;  %v1840_v55 = vrot.slane %v1839_v25, 4 }
 0x945   : > { %v1758_v42 = vrot.slane %v1757_v53, 2  ;;  %v1841_v51 = vadd.f32 %v1840_v55, %v1839_v25 }
 0x947   : > { %v1759_v45 = vadd.f32 %v1758_v42, %v1757_v53  ;;  %v1842_v56 = vrot.slane %v1841_v51, 2  ;;  %v2327_v42 = vld [vmem:[%s3362_s7 + $0x3] ss:$0 sm:$0xff] }
 0x949   : > { %v1760_v54 = vrot.slane %v1759_v45, 1  ;;  %v1843_v57 = vadd.f32 %v1842_v56, %v1841_v51  ;;  %v2328_v56 = vld [vmem:[%s3362_s7 + $0x4] ss:$0 sm:$0xff] }
 0x94b   : > { %v1761_v58 = vadd.f32 %v1760_v54, %v1759_v45  ;;  %v1844_v59 = vrot.slane %v1843_v57, 1 }
 0x94d   : > { %2683 = vmatmul.mubr.msk.f32.vlgmr.msra.gmra.mrb[48].mxu0 %vm704_vm5, %v1761_v58  ;;  %v1845_v60 = vadd.f32 %v1844_v59, %v1843_v57 }
 0x94e   : > { %2780 = vmatpush3.bf16.msra.mxu0 %v2755_v27  ;;  %2720 = vmatprep.mubr.msk.f32.mxu0 %vm2862_vm3, %v2863_v16 }
 0x94f   : > { %2702 = vmatmul.mubr.msk.f32.vlgmr.msra.gmra.mrb[36].mxu1 %vm704_vm5, %v1845_v60  ;;  %2781 = vmatprep.subr.bf16.mxu0 %v2861_v12 }
 0x950   : > { %2792 = vmatpush3.bf16.msra.mxu1 %v2755_v27  ;;  %2739 = vmatprep.mubr.msk.f32.mxu1 %vm2862_vm3, %v2863_v16 }
 0x951   : > { %2793 = vmatprep.subr.bf16.mxu1 %v2861_v12 }
 0x952   : > { %2783 = vmatpush3.bf16.msra.mxu0 %v2758_v30 }
 0x953   : > { %2784 = vmatprep.subr.bf16.mxu0 %v2861_v12 }
 0x954   : > { %2795 = vmatpush3.bf16.msra.mxu1 %v2758_v30 }
 0x955   : > { %2796 = vmatprep.subr.bf16.mxu1 %v2861_v12 }
 0x956   : > { %2786 = vmatpush3.bf16.msra.mxu0 %v2761_v32 }
 0x957   : > { %2787 = vmatprep.subr.bf16.mxu0 %v2861_v12 }
 0x958   : > { %2798 = vmatpush3.bf16.msra.mxu1 %v2761_v32 }
 0x959   : > { %2799 = vmatprep.subr.bf16.mxu1 %v2861_v12  ;;  %v2323_v12 = vld [vmem:[%s3362_s7 + $0x1] ss:$0 sm:$0xff] }
 0x95a   : > { %2789 = vmatpush3.bf16.msra.mxu0 %v2764_v35 }
 0x95c   : > { %2801 = vmatpush3.bf16.msra.mxu1 %v2764_v35 }
 0xa20   : > { %v1831_v61 = vpop.f32.mrb[48].mxu0 }
 0xa21   : > { %v1919_v62 = vmul.f32 %v1831_v61, %v1831_v61  ;;  %v2684_v63 = vpop.f32.mrb[49].mxu0  ;;  %v1924_v3 = vrot.slane %v1831_v61, %v3021_v36 }
 0xa22   : > { %v1915_v16 = vpop.f32.mrb[36].mxu1 }
 0xa23   : > { %v1920_v0 = vsub.f32 %v1915_v16, %v1919_v62  ;;  %v2703_v1 = vpop.f32.mrb[37].mxu1  ;;  %v1925_v18 = vsub.f32 %v1741_v41, %v1924_v3  ;;  %v1926_v19 = vsub.f32 %v1742_v47, %v1924_v3 }
 0xa25   : > { %v1927_v2 = vadd.f32 1e-05, %v1920_v0 }
 0xa27   : > { %2848 = vrsqrt.f32 %v1927_v2 }
 0xa31   : > { %v2849_v17 = vpop.eup %2848 }
 0xa32   : > { %v1932_v22 = vrot.slane %v2849_v17, %v3021_v36 }
 0xa34   : > { %v1933_v4 = vmul.f32 %v1932_v22, %v1925_v18  ;;  %v1934_v5 = vmul.f32 %v1932_v22, %v1926_v19 }
 0xa36   : > { %v1939_v7 = vmul.f32 %v2323_v12, %v1933_v4  ;;  %v1940_v8 = vmul.f32 %v2323_v12, %v1934_v5 }
 0xa38   : > { %v1945_v9 = vadd.f32 %v2324_v6, %v1939_v7  ;;  %v1946_v10 = vadd.f32 %v2324_v6, %v1940_v8 }
 0xa3a   : > { %v1947_v13 = vmax.f32 %v1945_v9, 0.0  ;;  %v1948_v14 = vmax.f32 %v1946_v10, 0.0 }
 0xa3c   : > { %v1951_v23 = vsel %vm704_vm5, %v1947_v13, 0.0  ;;  %v1952_v24 = vsel %vm704_vm5, %v1948_v14, 0.0  ;;  %v2033_v27 = vmul.f32 %v1947_v13, %v1947_v13  ;;  %v2034_v28 = vmul.f32 %v1948_v14, %v1948_v14 }
 0xa3d   : > { %v1953_v29 = vadd.f32 %v1952_v24, %v1951_v23 }
 0xa3e   : > { %v2035_v30 = vsel %vm704_vm5, %v2033_v27, 0.0  ;;  %v2036_v11 = vsel %vm704_vm5, %v2034_v28, 0.0 }
 0xa3f   : > { %v1954_v31 = vrot.slane %v1953_v29, 4  ;;  %v2037_v32 = vadd.f32 %v2036_v11, %v2035_v30 }
 0xa41   : > { %v1955_v33 = vadd.f32 %v1954_v31, %v1953_v29  ;;  %v2038_v34 = vrot.slane %v2037_v32, 4 }
 0xa43   : > { %v1956_v35 = vrot.slane %v1955_v33, 2  ;;  %v2039_v15 = vadd.f32 %v2038_v34, %v2037_v32 }
 0xa45   : > { %v1957_v37 = vadd.f32 %v1956_v35, %v1955_v33  ;;  %v2040_v38 = vrot.slane %v2039_v15, 2 }
 0xa47   : > { %v1958_v39 = vrot.slane %v1957_v37, 1  ;;  %v2041_v40 = vadd.f32 %v2040_v38, %v2039_v15 }
 0xa49   : > { %v1959_v41 = vadd.f32 %v1958_v39, %v1957_v37  ;;  %v2042_v43 = vrot.slane %v2041_v40, 1 }
 0xa4b   : > { %2721 = vmatmul.mubr.msk.f32.vlgmr.msra.gmra.mrb[50].mxu0 %vm704_vm5, %v1959_v41  ;;  %v2043_v44 = vadd.f32 %v2042_v43, %v2041_v40 }
 0xa4d   : > { %2740 = vmatmul.mubr.msk.f32.vlgmr.msra.gmra.mrb[38].mxu1 %vm704_vm5, %v2043_v44 }
 0xb1e   : > { %v2029_v46 = vpop.f32.mrb[50].mxu0 }
 0xb1f   : > { %v2117_v47 = vmul.f32 %v2029_v46, %v2029_v46  ;;  %v2722_v48 = vpop.f32.mrb[51].mxu0  ;;  %v2122_v20 = vrot.slane %v2029_v46, %v3021_v36 }
 0xb20   : > { %v2113_v21 = vpop.f32.mrb[38].mxu1 }
 0xb21   : > { %v2118_v49 = vsub.f32 %v2113_v21, %v2117_v47  ;;  %v2741_v26 = vpop.f32.mrb[39].mxu1  ;;  %v2123_v25 = vsub.f32 %v1947_v13, %v2122_v20  ;;  %v2124_v53 = vsub.f32 %v1948_v14, %v2122_v20 }
 0xb23   : > { %v2125_v50 = vadd.f32 1e-05, %v2118_v49 }
 0xb25   : > { %2850 = vrsqrt.f32 %v2125_v50 }
 0xb2f   : > { %v2851_v52 = vpop.eup %2850 }
 0xb30   : > { %v2130_v55 = vrot.slane %v2851_v52, %v3021_v36 }
 0xb32   : > { %v2131_v51 = vmul.f32 %v2130_v55, %v2123_v25  ;;  %v2132_v45 = vmul.f32 %v2130_v55, %v2124_v53 }
 0xb34   : > { %v2137_v54 = vmul.f32 %v2327_v42, %v2131_v51  ;;  %v2138_v57 = vmul.f32 %v2327_v42, %v2132_v45 }
 0xb36   : > { %v2143_v58 = vadd.f32 %v2328_v56, %v2137_v54  ;;  %v2144_v59 = vadd.f32 %v2328_v56, %v2138_v57 }
 0xb38   : > { %v2145_v60 = vmax.f32 %v2143_v58, 0.0  ;;  %v2146_v61 = vmax.f32 %v2144_v59, 0.0 }
 0xb3a   : > { %v2147_v36 = vsel %vm704_vm5, %v2145_v60, 0.0  ;;  %v2148_v62 = vsel %vm704_vm5, %v2146_v61, 0.0 }
 0xb3b   : > { %v2149_v63 = vadd.f32 %v2148_v62, %v2147_v36 }
 0xb3d   : > { %v2150_v16 = vrot.slane %v2149_v63, 4 }
 0xb3f   : > { %v2151_v0 = vadd.f32 %v2150_v16, %v2149_v63 }
 0xb41   : > { %v2152_v1 = vrot.slane %v2151_v0, 2 }
 0xb43   : > { %v2153_v2 = vadd.f32 %v2152_v1, %v2151_v0 }
 0xb45   : > { %v2154_v3 = vrot.slane %v2153_v2, 1 }
 0xb47   : > { %v2155_v17 = vadd.f32 %v2154_v3, %v2153_v2 }
 0xb49   : > { %v2156_v18 = vmul.f32 0.0625, %v2155_v17 }
 0xb4b   : > { %2158 = vst.msk [vmem:[%s303_s10] sm:$0x1] %vm2157_vm6, %v2156_v18 }
 0xb4c PF: > { %s18_s27 = sadd.s32 1, %s2858_s27  }
 0xb4d   : > { %p15_p5 = scmp.ge.s32.totalorder %s18_s27, 4  }
 0xb4f   :  { %17 = sbr.rel (!%p15_p5) target bundleno = 1 (0x1), region = 98 }

</bundles_post_ra>
